<compile_context>
chip_gen: v7x
topology: tpu7x:2x2x1
jax: 0.10.0
libtpu: 0.0.40
codegen_flags: <defaults>
</compile_context>

<pallas_src>
import functools

import jax
import jax.numpy as jnp
from jax import lax
from jax.experimental import pallas as pl
from jax.experimental.pallas import tpu as pltpu


def _round_up(n, m):
    return (n + m - 1) // m * m


def _vmem_capacity_bytes():
    """Physical per-TensorCore VMEM; conservative fallback if unavailable."""
    try:
        return int(pltpu.get_tpu_info().vmem_capacity_bytes)
    except Exception:
        return 64 << 20          # v7x floor; v5e/v6e have 128 MiB


def _ae_topk_kernel(x_ref, bdec_ref, wenc_ref, benc_ref, wdec_ref,
                    xhat_ref, feat_ref, *, k: int, unroll: bool):
    # --- encoder: relu((x - b_dec) @ W_enc^T + b_enc) -------------------------
    # Weights go straight to the MXU in their stored dtype (bf16 or f32); all
    # accumulation is f32 via preferred_element_type (no f32 weight copies).
    x = x_ref[...].astype(jnp.float32)                  # (TB, D)
    b_dec = bdec_ref[...].astype(jnp.float32)           # (1, D)
    xc = (x - b_dec).astype(wenc_ref.dtype)             # MXU operand in weight dtype
    pre = jnp.dot(xc, wenc_ref[...], preferred_element_type=jnp.float32)
    acts = jnp.maximum(pre + benc_ref[...].astype(jnp.float32), 0.0)   # (TB, F) f32

    # --- exact per-row top-k (ties -> lowest index), scattered to dense -------
    F = acts.shape[-1]
    # (1, F) iota; broadcasts against (TB, 1) / (TB, F) operands, so no
    # persistent (TB, F) int32 plane is kept live across the loop.
    col = lax.broadcasted_iota(jnp.int32, (1, F), 1)

    # k rounds of (argmax + mask-out).  acts >= 0 post-ReLU so -1.0 is a safe
    # "removed" sentinel.  Loop is rolled for k > 8 to keep vreg live ranges
    # and code size bounded (full unroll forced spills for large k).
    # TODO(synk): a true two-level (per-chunk maxima) selection needs a per-row
    # dynamic chunk gather which does not vectorize on the VPU; revisit with an
    # SMEM-driven per-row rescan (and F-tiled grid) for very large F (>=16K)
    # with k >= 16.
    def body(_, carry):
        work, enc = carry
        m = jnp.max(work, axis=-1, keepdims=True)                             # XLU
        sel = jnp.min(jnp.where(work == m, col, F), axis=-1, keepdims=True)   # XLU
        hit = col == sel
        enc = jnp.where(hit, work, enc)
        work = jnp.where(hit, jnp.float32(-1.0), work)
        return work, enc

    _, enc = lax.fori_loop(0, k, body, (acts, jnp.zeros_like(acts)),
                           unroll=unroll)

    # --- decoder: enc @ W_dec^T + b_dec ---------------------------------------
    x_hat = jnp.dot(enc.astype(wdec_ref.dtype), wdec_ref[...],
                    preferred_element_type=jnp.float32) + b_dec

    feat_ref[...] = enc.astype(feat_ref.dtype)
    xhat_ref[...] = x_hat.astype(xhat_ref.dtype)


def autoencoder_topk_forward(x, b_dec, w_enc_t, b_enc, w_dec_t, k, *, tb=None):
    """Forward pass of AutoEncoderTopK.

    x:        (B, D)   activations
    b_dec:    (D,) or (1, D)
    w_enc_t:  (D, F)   == encoder.weight.T
    b_enc:    (F,) or (1, F)
    w_dec_t:  (F, D)   == decoder.weight.T
    Returns (x_hat (B, D) f32, encoded_acts_BF (B, F) f32).
    """
    assert int(k) > 0
    B, D = x.shape
    Dw, F = w_enc_t.shape
    assert Dw == D and w_dec_t.shape == (F, D)
    b_dec = b_dec.reshape(1, D)
    b_enc = b_enc.reshape(1, F)

    vmem_cap = _vmem_capacity_bytes()

    # Resident bytes: weights + biases, single-buffered (constant index_map).
    wbytes = (w_enc_t.size * w_enc_t.dtype.itemsize
              + w_dec_t.size * w_dec_t.dtype.itemsize
              + b_enc.size * b_enc.dtype.itemsize
              + b_dec.size * b_dec.dtype.itemsize)

    def vmem_needed(tb_):
        io = 2 * tb_ * (D * x.dtype.itemsize + 4 * D + 4 * F)   # double-buffered x / x_hat / feats
        work = 3 * tb_ * F * 4 + 2 * tb_ * D * 4                # acts/work/enc planes + f32 (TB,D) temps
        return wbytes + io + work

    # Batch tile: largest MXU-friendly tile whose working set fits ~75% of VMEM
    # (v6e 128 MiB -> 256 rows; v7x 64 MiB -> typically 128/64 rows for big F).
    b_cap = _round_up(B, 8)
    if tb is None:
        tb_eff = min(8, b_cap)
        for cand in (256, 128, 64, 32, 16, 8):
            cand = min(cand, b_cap)
            if vmem_needed(cand) <= int(0.75 * vmem_cap):
                tb_eff = cand
                break
    else:
        tb_eff = min(_round_up(tb, 8), b_cap)
    # TODO(synk): if even tb=8 does not fit (v7x with F >= 64K), tile the
    # dictionary axis F across the grid and merge per-chunk top-k candidates.

    Bp = _round_up(B, tb_eff)
    if Bp != B:
        x = jnp.pad(x, ((0, Bp - B), (0, 0)))
    grid = (Bp // tb_eff,)

    kernel = functools.partial(_ae_topk_kernel, k=int(k), unroll=int(k) <= 8)

    # Scoped-VMEM request: actual working set + headroom, hard-capped at 90% of
    # the physical per-core VMEM (so never above 64 MiB on v7x).
    vmem_limit = int(min(max(vmem_needed(tb_eff) + (8 << 20), 32 << 20),
                         int(0.9 * vmem_cap)))

    cost = pl.CostEstimate(
        flops=4 * Bp * D * F,                            # two (Bp,D)x(D,F)-class matmuls
        transcendentals=0,
        bytes_accessed=int(Bp * D * x.dtype.itemsize + wbytes + Bp * (D + F) * 4),
    )

    def run(single_buffer_resident: bool):
        resident = (dict(pipeline_mode=pl.Buffered(1))
                    if single_buffer_resident else {})
        grid_spec = pltpu.PrefetchScalarGridSpec(
            num_scalar_prefetch=0,
            grid=grid,
            in_specs=[
                pl.BlockSpec((tb_eff, D), lambda i: (i, 0)),               # x (batch-tiled)
                pl.BlockSpec((1, D), lambda i: (0, 0), **resident),        # b_dec (resident)
                pl.BlockSpec((D, F), lambda i: (0, 0), **resident),        # W_enc^T (resident)
                pl.BlockSpec((1, F), lambda i: (0, 0), **resident),        # b_enc (resident)
                pl.BlockSpec((F, D), lambda i: (0, 0), **resident),        # W_dec^T (resident)
            ],
            out_specs=[
                pl.BlockSpec((tb_eff, D), lambda i: (i, 0)),               # x_hat
                pl.BlockSpec((tb_eff, F), lambda i: (i, 0)),               # encoded_acts_BF
            ],
        )
        return pl.pallas_call(
            kernel,
            out_shape=(
                jax.ShapeDtypeStruct((Bp, D), jnp.float32),
                jax.ShapeDtypeStruct((Bp, F), jnp.float32),
            ),
            grid_spec=grid_spec,
            compiler_params=pltpu.CompilerParams(
                dimension_semantics=("parallel",),
                vmem_limit_bytes=vmem_limit,
            ),
            cost_estimate=cost,
        )(x, b_dec, w_enc_t, b_enc, w_dec_t)

    try:
        x_hat, feats = run(single_buffer_resident=hasattr(pl, "Buffered"))
    except Exception:
        # Fallback: identical kernel with default (double-buffered) resident specs.
        x_hat, feats = run(single_buffer_resident=False)

    if Bp != B:
        x_hat = x_hat[:B]
        feats = feats[:B]
    return x_hat, feats


def _reference_forward(x, b_dec, w_enc_t, b_enc, w_dec_t, k):
    """Plain-JAX reference matching the PyTorch module semantics."""
    b_dec = b_dec.reshape(1, -1)
    b_enc = b_enc.reshape(1, -1)
    acts = jnp.maximum((x - b_dec) @ w_enc_t + b_enc, 0.0)
    vals, idx = lax.top_k(acts, k)
    enc = jnp.zeros_like(acts)
    b_idx = jnp.arange(acts.shape[0])[:, None]
    enc = enc.at[b_idx, idx].set(vals)
    x_hat = enc @ w_dec_t + b_dec
    return x_hat, enc


def init_params(key, activation_dim, dict_size):
    """Deterministic init mirroring AutoEncoderTopK.__init__ (tied, unit-norm)."""
    # decoder.weight: (activation_dim, dict_size), columns normalized to unit norm
    w_dec = jax.random.normal(key, (activation_dim, dict_size), dtype=jnp.float32)
    w_dec = w_dec / jnp.linalg.norm(w_dec, axis=0, keepdims=True)
    w_enc_t = w_dec                       # (D, F): encoder.weight.T
    w_dec_t = w_dec.T                     # (F, D): decoder.weight.T
    b_enc = jnp.zeros((1, dict_size), jnp.float32)
    b_dec = jnp.zeros((1, activation_dim), jnp.float32)
    return b_dec, w_enc_t, b_enc, w_dec_t


if __name__ == "__main__":
    activation_dim = 64
    dict_size = 256
    k = 4

    key = jax.random.PRNGKey(0)
    kx, kw, kx2 = jax.random.split(key, 3)
    b_dec, w_enc_t, b_enc, w_dec_t = init_params(kw, activation_dim, dict_size)

    # --- run 1: f32 weights, batch a multiple of 8 -----------------------------
    batch = 16
    x = jax.random.normal(kx, (batch, activation_dim), dtype=jnp.float32)
    x_hat, feats = autoencoder_topk_forward(x, b_dec, w_enc_t, b_enc, w_dec_t, k)
    x_hat, feats = jax.block_until_ready((x_hat, feats))

    x_hat_ref, feats_ref = _reference_forward(x, b_dec, w_enc_t, b_enc, w_dec_t, k)
    assert x_hat.shape == (batch, activation_dim) and feats.shape == (batch, dict_size)
    assert jnp.allclose(x_hat, x_hat_ref, atol=1e-4, rtol=1e-4)
    assert jnp.allclose(feats, feats_ref, atol=1e-4, rtol=1e-4)
    assert int(jnp.max(jnp.sum(feats > 0, axis=-1))) <= k

    # --- run 2: ragged batch (exercises the padding path) ----------------------
    batch2 = 12
    x2 = jax.random.normal(kx2, (batch2, activation_dim), dtype=jnp.float32)
    x_hat2, feats2 = autoencoder_topk_forward(x2, b_dec, w_enc_t, b_enc, w_dec_t, k)
    x_hat2, feats2 = jax.block_until_ready((x_hat2, feats2))
    x_hat2_ref, feats2_ref = _reference_forward(x2, b_dec, w_enc_t, b_enc, w_dec_t, k)
    assert x_hat2.shape == (batch2, activation_dim) and feats2.shape == (batch2, dict_size)
    assert jnp.allclose(x_hat2, x_hat2_ref, atol=1e-4, rtol=1e-4)
    assert jnp.allclose(feats2, feats2_ref, atol=1e-4, rtol=1e-4)

    # --- run 3: bf16 weights fed straight to the MXU (smoke test) --------------
    # Precision loss vs. the f32 reference is expected (intentional fast path).
    x_hat3, feats3 = autoencoder_topk_forward(
        x, b_dec, w_enc_t.astype(jnp.bfloat16), b_enc,
        w_dec_t.astype(jnp.bfloat16), k)
    x_hat3, feats3 = jax.block_until_ready((x_hat3, feats3))
    assert bool(jnp.all(jnp.isfinite(x_hat3)))
    assert int(jnp.max(jnp.sum(feats3 > 0, axis=-1))) <= k

    print("KERNEL_OK")
</pallas_src>

<mosaic_0001>
module attributes {stable_mosaic.version = 11 : i64} {
  func.func @_ae_topk_kernel(%arg0: i32, %arg1: memref<16x64xf32, #tpu.memory_space<vmem>>, %arg2: memref<1x64xf32, #tpu.memory_space<vmem>>, %arg3: memref<64x256xf32, #tpu.memory_space<vmem>>, %arg4: memref<1x256xf32, #tpu.memory_space<vmem>>, %arg5: memref<256x64xf32, #tpu.memory_space<vmem>>, %arg6: memref<16x64xf32, #tpu.memory_space<vmem>>, %arg7: memref<16x256xf32, #tpu.memory_space<vmem>>) attributes {dimension_semantics = [#tpu.dimension_semantics<parallel>], iteration_bounds = array<i64: 1>, scalar_prefetch = 0 : i64, scratch_operands = 0 : i64, tpu.core_type = #tpu.core_type<tc>, window_params = [{transform_indices = @transform_0, window_bounds = array<i64: 16, 64>}, {pipeline_mode = #tpu.pipeline_mode<synchronous>, transform_indices = @transform_1, window_bounds = array<i64: 1, 64>}, {pipeline_mode = #tpu.pipeline_mode<synchronous>, transform_indices = @transform_2, window_bounds = array<i64: 64, 256>}, {pipeline_mode = #tpu.pipeline_mode<synchronous>, transform_indices = @transform_3, window_bounds = array<i64: 1, 256>}, {pipeline_mode = #tpu.pipeline_mode<synchronous>, transform_indices = @transform_4, window_bounds = array<i64: 256, 64>}, {transform_indices = @transform_5, window_bounds = array<i64: 16, 64>}, {transform_indices = @transform_6, window_bounds = array<i64: 16, 256>}]} {
    %c0 = arith.constant 0 : index
    %c0_0 = arith.constant 0 : index
    %0 = vector.load %arg1[%c0, %c0_0] : memref<16x64xf32, #tpu.memory_space<vmem>>, vector<16x64xf32>
    %c0_1 = arith.constant 0 : index
    %c0_2 = arith.constant 0 : index
    %1 = vector.load %arg2[%c0_1, %c0_2] : memref<1x64xf32, #tpu.memory_space<vmem>>, vector<1x64xf32>
    %2 = vector.broadcast %1 : vector<1x64xf32> to vector<16x64xf32>
    %3 = arith.subf %0, %2 : vector<16x64xf32>
    %c0_3 = arith.constant 0 : index
    %c0_4 = arith.constant 0 : index
    %4 = vector.load %arg3[%c0_3, %c0_4] : memref<64x256xf32, #tpu.memory_space<vmem>>, vector<64x256xf32>
    %cst = arith.constant dense<0.000000e+00> : vector<16x256xf32>
    %5 = tpu.matmul %3, %4, %cst {dimension_numbers = #tpu.dot_dimension_numbers<[1], [0], [0], [1], [0, 0, 1, 1], [], []>} : vector<16x64xf32>, vector<64x256xf32>, vector<16x256xf32> -> vector<16x256xf32>
    %c0_5 = arith.constant 0 : index
    %c0_6 = arith.constant 0 : index
    %6 = vector.load %arg4[%c0_5, %c0_6] : memref<1x256xf32, #tpu.memory_space<vmem>>, vector<1x256xf32>
    %7 = vector.broadcast %6 : vector<1x256xf32> to vector<16x256xf32>
    %8 = arith.addf %5, %7 : vector<16x256xf32>
    %cst_7 = arith.constant 0.000000e+00 : f32
    %9 = vector.broadcast %cst_7 : f32 to vector<16x256xf32>
    %10 = arith.maximumf %8, %9 : vector<16x256xf32>
    %11 = tpu.iota {dimensions = array<i32: 1>} : vector<1x256xi32>
    %cst_8 = arith.constant 0.000000e+00 : f32
    %12 = vector.broadcast %cst_8 : f32 to vector<16x256xf32>
    %c0_i32 = arith.constant 0 : i32
    %cst_9 = arith.constant dense<0xFF800000> : vector<16xf32>
    %13 = vector.multi_reduction <maximumf>, %10, %cst_9 [1] : vector<16x256xf32> to vector<16xf32>
    %14 = vector.shape_cast %13 : vector<16xf32> to vector<16x1xf32>
    %15 = vector.broadcast %14 : vector<16x1xf32> to vector<16x256xf32>
    %16 = arith.cmpf oeq, %10, %15 : vector<16x256xf32>
    %c256_i32 = arith.constant 256 : i32
    %17 = vector.shape_cast %11 : vector<1x256xi32> to vector<1x256xi32>
    %18 = vector.broadcast %17 : vector<1x256xi32> to vector<16x256xi32>
    %19 = vector.broadcast %c256_i32 : i32 to vector<16x256xi32>
    %20 = arith.select %16, %18, %19 : vector<16x256xi1>, vector<16x256xi32>
    %cst_10 = arith.constant dense<2147483647> : vector<16xi32>
    %21 = vector.multi_reduction <minsi>, %20, %cst_10 [1] : vector<16x256xi32> to vector<16xi32>
    %22 = vector.shape_cast %21 : vector<16xi32> to vector<16x1xi32>
    %23 = vector.broadcast %11 : vector<1x256xi32> to vector<16x256xi32>
    %24 = vector.broadcast %22 : vector<16x1xi32> to vector<16x256xi32>
    %25 = arith.cmpi eq, %23, %24 : vector<16x256xi32>
    %26 = arith.select %25, %10, %12 : vector<16x256xi1>, vector<16x256xf32>
    %cst_11 = arith.constant -1.000000e+00 : f32
    %27 = vector.broadcast %cst_11 : f32 to vector<16x256xf32>
    %28 = arith.select %25, %27, %10 : vector<16x256xi1>, vector<16x256xf32>
    %c1_i32 = arith.constant 1 : i32
    %cst_12 = arith.constant dense<0xFF800000> : vector<16xf32>
    %29 = vector.multi_reduction <maximumf>, %28, %cst_12 [1] : vector<16x256xf32> to vector<16xf32>
    %30 = vector.shape_cast %29 : vector<16xf32> to vector<16x1xf32>
    %31 = vector.broadcast %30 : vector<16x1xf32> to vector<16x256xf32>
    %32 = arith.cmpf oeq, %28, %31 : vector<16x256xf32>
    %c256_i32_13 = arith.constant 256 : i32
    %33 = vector.shape_cast %11 : vector<1x256xi32> to vector<1x256xi32>
    %34 = vector.broadcast %33 : vector<1x256xi32> to vector<16x256xi32>
    %35 = vector.broadcast %c256_i32_13 : i32 to vector<16x256xi32>
    %36 = arith.select %32, %34, %35 : vector<16x256xi1>, vector<16x256xi32>
    %cst_14 = arith.constant dense<2147483647> : vector<16xi32>
    %37 = vector.multi_reduction <minsi>, %36, %cst_14 [1] : vector<16x256xi32> to vector<16xi32>
    %38 = vector.shape_cast %37 : vector<16xi32> to vector<16x1xi32>
    %39 = vector.broadcast %11 : vector<1x256xi32> to vector<16x256xi32>
    %40 = vector.broadcast %38 : vector<16x1xi32> to vector<16x256xi32>
    %41 = arith.cmpi eq, %39, %40 : vector<16x256xi32>
    %42 = arith.select %41, %28, %26 : vector<16x256xi1>, vector<16x256xf32>
    %cst_15 = arith.constant -1.000000e+00 : f32
    %43 = vector.broadcast %cst_15 : f32 to vector<16x256xf32>
    %44 = arith.select %41, %43, %28 : vector<16x256xi1>, vector<16x256xf32>
    %c2_i32 = arith.constant 2 : i32
    %cst_16 = arith.constant dense<0xFF800000> : vector<16xf32>
    %45 = vector.multi_reduction <maximumf>, %44, %cst_16 [1] : vector<16x256xf32> to vector<16xf32>
    %46 = vector.shape_cast %45 : vector<16xf32> to vector<16x1xf32>
    %47 = vector.broadcast %46 : vector<16x1xf32> to vector<16x256xf32>
    %48 = arith.cmpf oeq, %44, %47 : vector<16x256xf32>
    %c256_i32_17 = arith.constant 256 : i32
    %49 = vector.shape_cast %11 : vector<1x256xi32> to vector<1x256xi32>
    %50 = vector.broadcast %49 : vector<1x256xi32> to vector<16x256xi32>
    %51 = vector.broadcast %c256_i32_17 : i32 to vector<16x256xi32>
    %52 = arith.select %48, %50, %51 : vector<16x256xi1>, vector<16x256xi32>
    %cst_18 = arith.constant dense<2147483647> : vector<16xi32>
    %53 = vector.multi_reduction <minsi>, %52, %cst_18 [1] : vector<16x256xi32> to vector<16xi32>
    %54 = vector.shape_cast %53 : vector<16xi32> to vector<16x1xi32>
    %55 = vector.broadcast %11 : vector<1x256xi32> to vector<16x256xi32>
    %56 = vector.broadcast %54 : vector<16x1xi32> to vector<16x256xi32>
    %57 = arith.cmpi eq, %55, %56 : vector<16x256xi32>
    %58 = arith.select %57, %44, %42 : vector<16x256xi1>, vector<16x256xf32>
    %cst_19 = arith.constant -1.000000e+00 : f32
    %59 = vector.broadcast %cst_19 : f32 to vector<16x256xf32>
    %60 = arith.select %57, %59, %44 : vector<16x256xi1>, vector<16x256xf32>
    %c3_i32 = arith.constant 3 : i32
    %cst_20 = arith.constant dense<0xFF800000> : vector<16xf32>
    %61 = vector.multi_reduction <maximumf>, %60, %cst_20 [1] : vector<16x256xf32> to vector<16xf32>
    %62 = vector.shape_cast %61 : vector<16xf32> to vector<16x1xf32>
    %63 = vector.broadcast %62 : vector<16x1xf32> to vector<16x256xf32>
    %64 = arith.cmpf oeq, %60, %63 : vector<16x256xf32>
    %c256_i32_21 = arith.constant 256 : i32
    %65 = vector.shape_cast %11 : vector<1x256xi32> to vector<1x256xi32>
    %66 = vector.broadcast %65 : vector<1x256xi32> to vector<16x256xi32>
    %67 = vector.broadcast %c256_i32_21 : i32 to vector<16x256xi32>
    %68 = arith.select %64, %66, %67 : vector<16x256xi1>, vector<16x256xi32>
    %cst_22 = arith.constant dense<2147483647> : vector<16xi32>
    %69 = vector.multi_reduction <minsi>, %68, %cst_22 [1] : vector<16x256xi32> to vector<16xi32>
    %70 = vector.shape_cast %69 : vector<16xi32> to vector<16x1xi32>
    %71 = vector.broadcast %11 : vector<1x256xi32> to vector<16x256xi32>
    %72 = vector.broadcast %70 : vector<16x1xi32> to vector<16x256xi32>
    %73 = arith.cmpi eq, %71, %72 : vector<16x256xi32>
    %74 = arith.select %73, %60, %58 : vector<16x256xi1>, vector<16x256xf32>
    %cst_23 = arith.constant -1.000000e+00 : f32
    %75 = vector.broadcast %cst_23 : f32 to vector<16x256xf32>
    %76 = arith.select %73, %75, %60 : vector<16x256xi1>, vector<16x256xf32>
    %c0_24 = arith.constant 0 : index
    %c0_25 = arith.constant 0 : index
    %77 = vector.load %arg5[%c0_24, %c0_25] : memref<256x64xf32, #tpu.memory_space<vmem>>, vector<256x64xf32>
    %cst_26 = arith.constant dense<0.000000e+00> : vector<16x64xf32>
    %78 = tpu.matmul %74, %77, %cst_26 {dimension_numbers = #tpu.dot_dimension_numbers<[1], [0], [0], [1], [0, 0, 1, 1], [], []>} : vector<16x256xf32>, vector<256x64xf32>, vector<16x64xf32> -> vector<16x64xf32>
    %79 = vector.broadcast %1 : vector<1x64xf32> to vector<16x64xf32>
    %80 = arith.addf %78, %79 : vector<16x64xf32>
    %c0_27 = arith.constant 0 : index
    %c0_28 = arith.constant 0 : index
    %81 = vector.load %arg7[%c0_27, %c0_28] : memref<16x256xf32, #tpu.memory_space<vmem>>, vector<16x256xf32>
    tpu.vector_store %arg7[%c0_27, %c0_28], %74 {strides = array<i32>} : memref<16x256xf32, #tpu.memory_space<vmem>>, vector<16x256xf32>,
    %c0_29 = arith.constant 0 : index
    %c0_30 = arith.constant 0 : index
    %82 = vector.load %arg6[%c0_29, %c0_30] : memref<16x64xf32, #tpu.memory_space<vmem>>, vector<16x64xf32>
    tpu.vector_store %arg6[%c0_29, %c0_30], %80 {strides = array<i32>} : memref<16x64xf32, #tpu.memory_space<vmem>>, vector<16x64xf32>,
    return
  }
  func.func @transform_0(%arg0: i32) -> (i32, i32) {
    %c0_i32 = arith.constant 0 : i32
    %c0_i32_0 = arith.constant 0 : i32
    return %arg0, %c0_i32 : i32, i32
  }
  func.func @transform_1(%arg0: i32) -> (i32, i32) {
    %c0_i32 = arith.constant 0 : i32
    %c0_i32_0 = arith.constant 0 : i32
    %c0_i32_1 = arith.constant 0 : i32
    return %c0_i32, %c0_i32_0 : i32, i32
  }
  func.func @transform_2(%arg0: i32) -> (i32, i32) {
    %c0_i32 = arith.constant 0 : i32
    %c0_i32_0 = arith.constant 0 : i32
    %c0_i32_1 = arith.constant 0 : i32
    return %c0_i32, %c0_i32_0 : i32, i32
  }
  func.func @transform_3(%arg0: i32) -> (i32, i32) {
    %c0_i32 = arith.constant 0 : i32
    %c0_i32_0 = arith.constant 0 : i32
    %c0_i32_1 = arith.constant 0 : i32
    return %c0_i32, %c0_i32_0 : i32, i32
  }
  func.func @transform_4(%arg0: i32) -> (i32, i32) {
    %c0_i32 = arith.constant 0 : i32
    %c0_i32_0 = arith.constant 0 : i32
    %c0_i32_1 = arith.constant 0 : i32
    return %c0_i32, %c0_i32_0 : i32, i32
  }
  func.func @transform_5(%arg0: i32) -> (i32, i32) {
    %c0_i32 = arith.constant 0 : i32
    %c0_i32_0 = arith.constant 0 : i32
    return %arg0, %c0_i32 : i32, i32
  }
  func.func @transform_6(%arg0: i32) -> (i32, i32) {
    %c0_i32 = arith.constant 0 : i32
    %c0_i32_0 = arith.constant 0 : i32
    return %arg0, %c0_i32 : i32, i32
  }
}

module attributes {stable_mosaic.version = 11 : i64} {
  func.func @_ae_topk_kernel(%arg0: i32, %arg1: memref<16x64xf32, #tpu.memory_space<vmem>>, %arg2: memref<1x64xf32, #tpu.memory_space<vmem>>, %arg3: memref<64x256xf32, #tpu.memory_space<vmem>>, %arg4: memref<1x256xf32, #tpu.memory_space<vmem>>, %arg5: memref<256x64xf32, #tpu.memory_space<vmem>>, %arg6: memref<16x64xf32, #tpu.memory_space<vmem>>, %arg7: memref<16x256xf32, #tpu.memory_space<vmem>>) attributes {dimension_semantics = [#tpu.dimension_semantics<parallel>], iteration_bounds = array<i64: 1>, scalar_prefetch = 0 : i64, scratch_operands = 0 : i64, tpu.core_type = #tpu.core_type<tc>, window_params = [{transform_indices = @transform_0, window_bounds = array<i64: 16, 64>}, {pipeline_mode = #tpu.pipeline_mode<synchronous>, transform_indices = @transform_1, window_bounds = array<i64: 1, 64>}, {pipeline_mode = #tpu.pipeline_mode<synchronous>, transform_indices = @transform_2, window_bounds = array<i64: 64, 256>}, {pipeline_mode = #tpu.pipeline_mode<synchronous>, transform_indices = @transform_3, window_bounds = array<i64: 1, 256>}, {pipeline_mode = #tpu.pipeline_mode<synchronous>, transform_indices = @transform_4, window_bounds = array<i64: 256, 64>}, {transform_indices = @transform_5, window_bounds = array<i64: 16, 64>}, {transform_indices = @transform_6, window_bounds = array<i64: 16, 256>}]} {
    %c0 = arith.constant 0 : index
    %c0_0 = arith.constant 0 : index
    %0 = vector.load %arg1[%c0, %c0_0] : memref<16x64xf32, #tpu.memory_space<vmem>>, vector<16x64xf32>
    %c0_1 = arith.constant 0 : index
    %c0_2 = arith.constant 0 : index
    %1 = vector.load %arg2[%c0_1, %c0_2] : memref<1x64xf32, #tpu.memory_space<vmem>>, vector<1x64xf32>
    %2 = vector.broadcast %1 : vector<1x64xf32> to vector<16x64xf32>
    %3 = arith.subf %0, %2 : vector<16x64xf32>
    %c0_3 = arith.constant 0 : index
    %c0_4 = arith.constant 0 : index
    %4 = vector.load %arg3[%c0_3, %c0_4] : memref<64x256xf32, #tpu.memory_space<vmem>>, vector<64x256xf32>
    %cst = arith.constant dense<0.000000e+00> : vector<16x256xf32>
    %5 = tpu.matmul %3, %4, %cst {dimension_numbers = #tpu.dot_dimension_numbers<[1], [0], [0], [1], [0, 0, 1, 1], [], []>} : vector<16x64xf32>, vector<64x256xf32>, vector<16x256xf32> -> vector<16x256xf32>
    %c0_5 = arith.constant 0 : index
    %c0_6 = arith.constant 0 : index
    %6 = vector.load %arg4[%c0_5, %c0_6] : memref<1x256xf32, #tpu.memory_space<vmem>>, vector<1x256xf32>
    %7 = vector.broadcast %6 : vector<1x256xf32> to vector<16x256xf32>
    %8 = arith.addf %5, %7 : vector<16x256xf32>
    %cst_7 = arith.constant 0.000000e+00 : f32
    %9 = vector.broadcast %cst_7 : f32 to vector<16x256xf32>
    %10 = arith.maximumf %8, %9 : vector<16x256xf32>
    %11 = tpu.iota {dimensions = array<i32: 1>} : vector<1x256xi32>
    %cst_8 = arith.constant 0.000000e+00 : f32
    %12 = vector.broadcast %cst_8 : f32 to vector<16x256xf32>
    %c0_i32 = arith.constant 0 : i32
    %cst_9 = arith.constant dense<0xFF800000> : vector<16xf32>
    %13 = vector.multi_reduction <maximumf>, %10, %cst_9 [1] : vector<16x256xf32> to vector<16xf32>
    %14 = vector.shape_cast %13 : vector<16xf32> to vector<16x1xf32>
    %15 = vector.broadcast %14 : vector<16x1xf32> to vector<16x256xf32>
    %16 = arith.cmpf oeq, %10, %15 : vector<16x256xf32>
    %c256_i32 = arith.constant 256 : i32
    %17 = vector.shape_cast %11 : vector<1x256xi32> to vector<1x256xi32>
    %18 = vector.broadcast %17 : vector<1x256xi32> to vector<16x256xi32>
    %19 = vector.broadcast %c256_i32 : i32 to vector<16x256xi32>
    %20 = arith.select %16, %18, %19 : vector<16x256xi1>, vector<16x256xi32>
    %cst_10 = arith.constant dense<2147483647> : vector<16xi32>
    %21 = vector.multi_reduction <minsi>, %20, %cst_10 [1] : vector<16x256xi32> to vector<16xi32>
    %22 = vector.shape_cast %21 : vector<16xi32> to vector<16x1xi32>
    %23 = vector.broadcast %11 : vector<1x256xi32> to vector<16x256xi32>
    %24 = vector.broadcast %22 : vector<16x1xi32> to vector<16x256xi32>
    %25 = arith.cmpi eq, %23, %24 : vector<16x256xi32>
    %26 = arith.select %25, %10, %12 : vector<16x256xi1>, vector<16x256xf32>
    %cst_11 = arith.constant -1.000000e+00 : f32
    %27 = vector.broadcast %cst_11 : f32 to vector<16x256xf32>
    %28 = arith.select %25, %27, %10 : vector<16x256xi1>, vector<16x256xf32>
    %c1_i32 = arith.constant 1 : i32
    %cst_12 = arith.constant dense<0xFF800000> : vector<16xf32>
    %29 = vector.multi_reduction <maximumf>, %28, %cst_12 [1] : vector<16x256xf32> to vector<16xf32>
    %30 = vector.shape_cast %29 : vector<16xf32> to vector<16x1xf32>
    %31 = vector.broadcast %30 : vector<16x1xf32> to vector<16x256xf32>
    %32 = arith.cmpf oeq, %28, %31 : vector<16x256xf32>
    %c256_i32_13 = arith.constant 256 : i32
    %33 = vector.shape_cast %11 : vector<1x256xi32> to vector<1x256xi32>
    %34 = vector.broadcast %33 : vector<1x256xi32> to vector<16x256xi32>
    %35 = vector.broadcast %c256_i32_13 : i32 to vector<16x256xi32>
    %36 = arith.select %32, %34, %35 : vector<16x256xi1>, vector<16x256xi32>
    %cst_14 = arith.constant dense<2147483647> : vector<16xi32>
    %37 = vector.multi_reduction <minsi>, %36, %cst_14 [1] : vector<16x256xi32> to vector<16xi32>
    %38 = vector.shape_cast %37 : vector<16xi32> to vector<16x1xi32>
    %39 = vector.broadcast %11 : vector<1x256xi32> to vector<16x256xi32>
    %40 = vector.broadcast %38 : vector<16x1xi32> to vector<16x256xi32>
    %41 = arith.cmpi eq, %39, %40 : vector<16x256xi32>
    %42 = arith.select %41, %28, %26 : vector<16x256xi1>, vector<16x256xf32>
    %cst_15 = arith.constant -1.000000e+00 : f32
    %43 = vector.broadcast %cst_15 : f32 to vector<16x256xf32>
    %44 = arith.select %41, %43, %28 : vector<16x256xi1>, vector<16x256xf32>
    %c2_i32 = arith.constant 2 : i32
    %cst_16 = arith.constant dense<0xFF800000> : vector<16xf32>
    %45 = vector.multi_reduction <maximumf>, %44, %cst_16 [1] : vector<16x256xf32> to vector<16xf32>
    %46 = vector.shape_cast %45 : vector<16xf32> to vector<16x1xf32>
    %47 = vector.broadcast %46 : vector<16x1xf32> to vector<16x256xf32>
    %48 = arith.cmpf oeq, %44, %47 : vector<16x256xf32>
    %c256_i32_17 = arith.constant 256 : i32
    %49 = vector.shape_cast %11 : vector<1x256xi32> to vector<1x256xi32>
    %50 = vector.broadcast %49 : vector<1x256xi32> to vector<16x256xi32>
    %51 = vector.broadcast %c256_i32_17 : i32 to vector<16x256xi32>
    %52 = arith.select %48, %50, %51 : vector<16x256xi1>, vector<16x256xi32>
    %cst_18 = arith.constant dense<2147483647> : vector<16xi32>
    %53 = vector.multi_reduction <minsi>, %52, %cst_18 [1] : vector<16x256xi32> to vector<16xi32>
    %54 = vector.shape_cast %53 : vector<16xi32> to vector<16x1xi32>
    %55 = vector.broadcast %11 : vector<1x256xi32> to vector<16x256xi32>
    %56 = vector.broadcast %54 : vector<16x1xi32> to vector<16x256xi32>
    %57 = arith.cmpi eq, %55, %56 : vector<16x256xi32>
    %58 = arith.select %57, %44, %42 : vector<16x256xi1>, vector<16x256xf32>
    %cst_19 = arith.constant -1.000000e+00 : f32
    %59 = vector.broadcast %cst_19 : f32 to vector<16x256xf32>
    %60 = arith.select %57, %59, %44 : vector<16x256xi1>, vector<16x256xf32>
    %c3_i32 = arith.constant 3 : i32
    %cst_20 = arith.constant dense<0xFF800000> : vector<16xf32>
    %61 = vector.multi_reduction <maximumf>, %60, %cst_20 [1] : vector<16x256xf32> to vector<16xf32>
    %62 = vector.shape_cast %61 : vector<16xf32> to vector<16x1xf32>
    %63 = vector.broadcast %62 : vector<16x1xf32> to vector<16x256xf32>
    %64 = arith.cmpf oeq, %60, %63 : vector<16x256xf32>
    %c256_i32_21 = arith.constant 256 : i32
    %65 = vector.shape_cast %11 : vector<1x256xi32> to vector<1x256xi32>
    %66 = vector.broadcast %65 : vector<1x256xi32> to vector<16x256xi32>
    %67 = vector.broadcast %c256_i32_21 : i32 to vector<16x256xi32>
    %68 = arith.select %64, %66, %67 : vector<16x256xi1>, vector<16x256xi32>
    %cst_22 = arith.constant dense<2147483647> : vector<16xi32>
    %69 = vector.multi_reduction <minsi>, %68, %cst_22 [1] : vector<16x256xi32> to vector<16xi32>
    %70 = vector.shape_cast %69 : vector<16xi32> to vector<16x1xi32>
    %71 = vector.broadcast %11 : vector<1x256xi32> to vector<16x256xi32>
    %72 = vector.broadcast %70 : vector<16x1xi32> to vector<16x256xi32>
    %73 = arith.cmpi eq, %71, %72 : vector<16x256xi32>
    %74 = arith.select %73, %60, %58 : vector<16x256xi1>, vector<16x256xf32>
    %cst_23 = arith.constant -1.000000e+00 : f32
    %75 = vector.broadcast %cst_23 : f32 to vector<16x256xf32>
    %76 = arith.select %73, %75, %60 : vector<16x256xi1>, vector<16x256xf32>
    %c0_24 = arith.constant 0 : index
    %c0_25 = arith.constant 0 : index
    %77 = vector.load %arg5[%c0_24, %c0_25] : memref<256x64xf32, #tpu.memory_space<vmem>>, vector<256x64xf32>
    %cst_26 = arith.constant dense<0.000000e+00> : vector<16x64xf32>
    %78 = tpu.matmul %74, %77, %cst_26 {dimension_numbers = #tpu.dot_dimension_numbers<[1], [0], [0], [1], [0, 0, 1, 1], [], []>} : vector<16x256xf32>, vector<256x64xf32>, vector<16x64xf32> -> vector<16x64xf32>
    %79 = vector.broadcast %1 : vector<1x64xf32> to vector<16x64xf32>
    %80 = arith.addf %78, %79 : vector<16x64xf32>
    %c0_27 = arith.constant 0 : index
    %c0_28 = arith.constant 0 : index
    %81 = vector.load %arg7[%c0_27, %c0_28] : memref<16x256xf32, #tpu.memory_space<vmem>>, vector<16x256xf32>
    tpu.vector_store %arg7[%c0_27, %c0_28], %74 {strides = array<i32>} : memref<16x256xf32, #tpu.memory_space<vmem>>, vector<16x256xf32>,
    %c0_29 = arith.constant 0 : index
    %c0_30 = arith.constant 0 : index
    %82 = vector.load %arg6[%c0_29, %c0_30] : memref<16x64xf32, #tpu.memory_space<vmem>>, vector<16x64xf32>
    tpu.vector_store %arg6[%c0_29, %c0_30], %80 {strides = array<i32>} : memref<16x64xf32, #tpu.memory_space<vmem>>, vector<16x64xf32>,
    return
  }
  func.func @transform_0(%arg0: i32) -> (i32, i32) {
    %c0_i32 = arith.constant 0 : i32
    %c0_i32_0 = arith.constant 0 : i32
    return %arg0, %c0_i32 : i32, i32
  }
  func.func @transform_1(%arg0: i32) -> (i32, i32) {
    %c0_i32 = arith.constant 0 : i32
    %c0_i32_0 = arith.constant 0 : i32
    %c0_i32_1 = arith.constant 0 : i32
    return %c0_i32, %c0_i32_0 : i32, i32
  }
  func.func @transform_2(%arg0: i32) -> (i32, i32) {
    %c0_i32 = arith.constant 0 : i32
    %c0_i32_0 = arith.constant 0 : i32
    %c0_i32_1 = arith.constant 0 : i32
    return %c0_i32, %c0_i32_0 : i32, i32
  }
  func.func @transform_3(%arg0: i32) -> (i32, i32) {
    %c0_i32 = arith.constant 0 : i32
    %c0_i32_0 = arith.constant 0 : i32
    %c0_i32_1 = arith.constant 0 : i32
    return %c0_i32, %c0_i32_0 : i32, i32
  }
  func.func @transform_4(%arg0: i32) -> (i32, i32) {
    %c0_i32 = arith.constant 0 : i32
    %c0_i32_0 = arith.constant 0 : i32
    %c0_i32_1 = arith.constant 0 : i32
    return %c0_i32, %c0_i32_0 : i32, i32
  }
  func.func @transform_5(%arg0: i32) -> (i32, i32) {
    %c0_i32 = arith.constant 0 : i32
    %c0_i32_0 = arith.constant 0 : i32
    return %arg0, %c0_i32 : i32, i32
  }
  func.func @transform_6(%arg0: i32) -> (i32, i32) {
    %c0_i32 = arith.constant 0 : i32
    %c0_i32_0 = arith.constant 0 : i32
    return %arg0, %c0_i32 : i32, i32
  }
}

</mosaic_0001>

<bundles_post_ra>
// kernel: tpu_custom_call.1
= control target key start
LH: loop header
LB: loop body
LE: loop exit
PB: predicated region body
PF: predicated region fallthrough
CT: control target
= control target key end

     0   :  { %12 = vsyncpa [#allocation3], 0  ;;  %v671_v7 = vmov 0.0   ;;  %s1040_s0 = inlined_call_operand.vmem [shape: f32[16,64], index: 0, kind: input, shape index: {}]   ;;  %s1041_s1 = inlined_call_operand.vmem [shape: f32[1,64], index: 1, kind: input, shape index: {}]   ;;  %s1042_s2 = inlined_call_operand.vmem [shape: f32[64,256], index: 2, kind: input, shape index: {}]   ;;  %s1043_s3 = inlined_call_operand.vmem [shape: f32[1,256], index: 3, kind: input, shape index: {}]   ;;  %s1044_s4 = inlined_call_operand.vmem [shape: f32[256,64], index: 4, kind: input, shape index: {}]   ;;  %s1045_s5 = inlined_call_operand.hbm [shape: f32[16,64], index: 5, kind: output, shape index: {0}]   ;;  %s1046_s6 = inlined_call_operand.hbm [shape: f32[16,256], index: 6, kind: output, shape index: {1}]  }
   0x1   :  { %v36_v0 = vld [vmem:[%s1042_s2 + $0x8] sm:$0xff]  ;;  %v38_v1 = vld [vmem:[%s1042_s2 + $0x18] sm:$0xff]  ;;  %v35_v2 = vld [vmem:[%s1042_s2] sm:$0xff]  ;;  %134 = vmatprep.mubr.f32.mxu0 %v671_v7 }
   0x2   :  { %v568_v3 = vpack.c.bf16 %v38_v1, %v36_v0  ;;  %v37_v4 = vld [vmem:[%s1042_s2 + $0x10] sm:$0xff]  ;;  %v40_v5 = vld [vmem:[%s1042_s2 + $0x28] sm:$0xff]  ;;  %v42_v6 = vld [vmem:[%s1042_s2 + $0x38] sm:$0xff] }
   0x3   :  { %v570_v8 = vpack.c.bf16 %v37_v4, %v35_v2  ;;  %v572_v9 = vpack.c.bf16 %v42_v6, %v40_v5  ;;  %v39_v10 = vld [vmem:[%s1042_s2 + $0x20] sm:$0xff]  ;;  %v41_v11 = vld [vmem:[%s1042_s2 + $0x30] sm:$0xff]  ;;  %v44_v12 = vld [vmem:[%s1042_s2 + $0x48] sm:$0xff] }
   0x4   :  { %569 = vmatprep.subr.bf16.mxu0 %v568_v3  ;;  %v46_v13 = vld [vmem:[%s1042_s2 + $0x58] sm:$0xff]  ;;  %v574_v14 = vpack.c.bf16 %v41_v11, %v39_v10  ;;  %v43_v16 = vld [vmem:[%s1042_s2 + $0x40] sm:$0xff]  ;;  %v45_v17 = vld [vmem:[%s1042_s2 + $0x50] sm:$0xff] }
   0x5   :  { %571 = vmatpush1.bf16.msra.mxu0 %v570_v8  ;;  %v576_v15 = vpack.c.bf16 %v46_v13, %v44_v12  ;;  %v48_v18 = vld [vmem:[%s1042_s2 + $0x68] sm:$0xff]  ;;  %v50_v19 = vld [vmem:[%s1042_s2 + $0x78] sm:$0xff] }
   0x6   :  { %573 = vmatprep.subr.bf16.mxu0 %v572_v9 }
   0x7   :  { %13 = vsyncpa [#allocation5], 0  ;;  %v578_v20 = vpack.c.bf16 %v45_v17, %v43_v16  ;;  %v580_v21 = vpack.c.bf16 %v50_v19, %v48_v18  ;;  %v47_v22 = vld [vmem:[%s1042_s2 + $0x60] sm:$0xff]  ;;  %v49_v23 = vld [vmem:[%s1042_s2 + $0x70] sm:$0xff]  ;;  %vm63_vm0 = vcmask 523264   ;;  %v53_v30 = vlaneseq }
   0x8   :  { %v582_v24 = vpack.c.bf16 %v49_v23, %v47_v22  ;;  %v24_v25 = vld [vmem:[%s1040_s0] sm:$0xff]  ;;  %v25_v28 = vld [vmem:[%s1040_s0 + $0x8] sm:$0xff] }
   0x9   :  { %575 = vmatpush1.bf16.msra.mxu0 %v574_v14  ;;  %v767_v26 = vld [vmem:[%s1041_s1] ss:$0 sm:$0xff]  ;;  %v54_v31 = vshrl.u32 %v53_v30, 7  ;;  %v791_v51 = vand.u32 127, %v53_v30 }
   0xa   :  { %577 = vmatprep.subr.bf16.mxu0 %v576_v15  ;;  %v33_v27 = vsub.f32 %v24_v25, %v767_v26  ;;  %v34_v29 = vsub.f32 %v25_v28, %v767_v26  ;;  %v51_v33 = vld [vmem:[%s1043_s3] sm:$0x3] }
   0xb   :  { %v55_v32 = vsub.s32 0, %v54_v31  ;;  %v59_v34 = vsub.s32 1, %v54_v31  ;;  %v794_v52 = vadd.s32 128, %v791_v51 }
   0xd   :  { %579 = vmatpush1.bf16.msra.mxu0 %v578_v20  ;;  %v56_v35 = vrot.slane %v51_v33, %v55_v32  ;;  %v60_v36 = vrot.slane %v51_v33, %v59_v34 }
   0xe   :  { %581 = vmatprep.subr.bf16.mxu0 %v580_v21 }
  0x11   :  { %583 = vmatpush1.bf16.msra.mxu0 %v582_v24 }
  0x14   :  { %528 = vmatmul.mubr.msk.f32.vlgmr.msra.gmra.mrb[0].mxu0 %vm63_vm0, %v33_v27 }
  0x15   :  { %140 = vmatprep.mubr.f32.mxu0 %v671_v7 }
  0x18   :  { %529 = vmatmul.mubr.msk.f32.gmra.mrb[2].mxu0 %vm63_vm0, %v34_v29 }
  0xe7   :  { %v136_v37 = vpop.f32.mrb[0].mxu0 }
  0xe8   :  { %v137_v38 = vadd.f32 %v136_v37, %v56_v35  ;;  %v138_v39 = vpop.f32.mrb[1].mxu0 }
  0xe9   :  { %v139_v40 = vadd.f32 %v138_v39, %v60_v36 }
  0xea   :  { %v779_v41 = vmax.f32 %v137_v38, 0.0 }
  0xeb   :  { %v781_v42 = vmax.f32 %v139_v40, 0.0  ;;  %v142_v43 = vpop.f32.mrb[2].mxu0 }
  0xec   :  { %v143_v44 = vadd.f32 %v142_v43, %v56_v35  ;;  %v144_v45 = vpop.f32.mrb[3].mxu0 }
  0xed   :  { %v145_v46 = vadd.f32 %v144_v45, %v60_v36  ;;  %v154_v47 = vmax.f32 %v779_v41, %v781_v42 }
  0xee   :  { %v785_v48 = vmax.f32 %v143_v44, 0.0 }
  0xef   :  { %v787_v49 = vmax.f32 %v145_v46, 0.0  ;;  %155 = vmax.xlane.f32.xlu0 %v154_v47 }
  0xf1   :  { %v157_v50 = vmax.f32 %v785_v48, %v787_v49 }
  0xf3   :  { %158 = vmax.xlane.f32.xlu0 %v157_v50 }
 0x17c   :  { %v156_v53 = vpop.xlane.xlu0 %155 }
 0x17d   :  { %vm160_vm1 = vcmp.eq.f32.partialorder %v779_v41, %v156_v53  ;;  %vm161_vm2 = vcmp.eq.f32.partialorder %v781_v42, %v156_v53 }
 0x17e   :  { %v164_v54 = vsel %vm160_vm1, %v791_v51, 256  ;;  %v165_v55 = vsel %vm161_vm2, %v794_v52, 256 }
 0x17f   :  { %vm168_vm3 = vcmp.lt.s32.totalorder %v164_v54, %v165_v55 }
 0x180   :  { %v159_v56 = vpop.xlane.xlu0 %158  ;;  %v169_v57 = vsel %vm168_vm3, %v164_v54, %v165_v55 }
 0x181   :  { %vm162_vm4 = vcmp.eq.f32.partialorder %v785_v48, %v159_v56  ;;  %vm163_vm5 = vcmp.eq.f32.partialorder %v787_v49, %v159_v56  ;;  %v171_v58 = vshra.s32 %v169_v57, 16  ;;  %v170_v1 = vand.u32 65535, %v169_v57 }
 0x182   :  { %v166_v59 = vsel %vm162_vm4, %v791_v51, 256  ;;  %v167_v60 = vsel %vm163_vm5, %v794_v52, 256 }
 0x183   :  { %vm184_vm6 = vcmp.lt.s32.totalorder %v166_v59, %v167_v60  ;;  %v173_v61 = vcvt.s32.f32 %v171_v58  ;;  %v172_v3 = vcvt.s32.f32 %v170_v1 }
 0x184   :  { %v185_v62 = vsel %vm184_vm6, %v166_v59, %v167_v60 }
 0x185   :  { %174 = vmin.xlane.f32.xlu1 %v173_v61  ;;  %v187_v63 = vshra.s32 %v185_v62, 16  ;;  %v186_v4 = vand.u32 65535, %v185_v62 }
 0x187   :  { %v189_v0 = vcvt.s32.f32 %v187_v63  ;;  %v188_v7 = vcvt.s32.f32 %v186_v4 }
 0x189   :  { %190 = vmin.xlane.f32.xlu1 %v189_v0 }
 0x212   :  { %v175_v2 = vpop.xlane.xlu1 %174 }
 0x213   :  { %vm176_vm7 = vcmp.eq.f32.partialorder %v173_v61, %v175_v2  ;;  %v181_v9 = vcvt.f32.s32 %v175_v2 }
 0x214   :  { %v177_v5 = vsel %vm176_vm7, %v172_v3, inf }
 0x215   :  { %178 = vmin.xlane.f32.xlu0 %v177_v5  ;;  %v182_v11 = vshll.u32 %v181_v9, 16 }
 0x216   :  { %v191_v6 = vpop.xlane.xlu1 %190 }
 0x217   :  { %vm192_vm8 = vcmp.eq.f32.partialorder %v189_v0, %v191_v6  ;;  %v197_v12 = vcvt.f32.s32 %v191_v6 }
 0x218   :  { %v193_v8 = vsel %vm192_vm8, %v188_v7, inf }
 0x219   :  { %194 = vmin.xlane.f32.xlu1 %v193_v8  ;;  %v198_v16 = vshll.u32 %v197_v12, 16 }
 0x2a2   :  { %v179_v10 = vpop.xlane.xlu0 %178 }
 0x2a3   :  { %v180_v13 = vcvt.f32.s32 %v179_v10 }
 0x2a5   :  { %v183_v14 = vadd.s32 %v182_v11, %v180_v13 }
 0x2a6   :  { %v195_v15 = vpop.xlane.xlu1 %194 }
 0x2a7   :  { %vm200_vm9 = vcmp.eq.s32.totalorder %v791_v51, %v183_v14  ;;  %vm201_vm10 = vcmp.eq.s32.totalorder %v794_v52, %v183_v14  ;;  %v196_v17 = vcvt.f32.s32 %v195_v15 }
 0x2a8   :  { %v208_v18 = vsel %vm200_vm9, -1.0, %v779_v41  ;;  %v209_v19 = vsel %vm201_vm10, -1.0, %v781_v42  ;;  %v204_v58 = vsel %vm200_vm9, %v779_v41, 0.0  ;;  %v205_v59 = vsel %vm201_vm10, %v781_v42, 0.0 }
 0x2a9   :  { %v199_v20 = vadd.s32 %v198_v16, %v196_v17  ;;  %v212_v21 = vmax.f32 %v208_v18, %v209_v19 }
 0x2ab   :  { %vm202_vm11 = vcmp.eq.s32.totalorder %v791_v51, %v199_v20  ;;  %vm203_vm12 = vcmp.eq.s32.totalorder %v794_v52, %v199_v20  ;;  %213 = vmax.xlane.f32.xlu0 %v212_v21 }
 0x2ac   :  { %v817_v22 = vsel %vm202_vm11, -1.0, %v785_v48  ;;  %v211_v23 = vsel %vm203_vm12, -1.0, %v787_v49  ;;  %v206_v41 = vsel %vm202_vm11, %v785_v48, 0.0  ;;  %v207_v42 = vsel %vm203_vm12, %v787_v49, 0.0 }
 0x2ad   :  { %v215_v24 = vmax.f32 %v817_v22, %v211_v23 }
 0x2af   :  { %216 = vmax.xlane.f32.xlu1 %v215_v24 }
 0x338   :  { %v214_v25 = vpop.xlane.xlu0 %213 }
 0x339   :  { %vm218_vm13 = vcmp.eq.f32.partialorder %v208_v18, %v214_v25  ;;  %vm219_vm14 = vcmp.eq.f32.partialorder %v209_v19, %v214_v25 }
 0x33a   :  { %v222_v27 = vsel %vm218_vm13, %v791_v51, 256  ;;  %v223_v28 = vsel %vm219_vm14, %v794_v52, 256 }
 0x33b   :  { %vm226_vm15 = vcmp.lt.s32.totalorder %v222_v27, %v223_v28 }
 0x33c   :  { %v217_v29 = vpop.xlane.xlu1 %216  ;;  %v227_v30 = vsel %vm226_vm15, %v222_v27, %v223_v28 }
 0x33d   :  { %vm220_vm1 = vcmp.eq.f32.partialorder %v817_v22, %v217_v29  ;;  %vm221_vm2 = vcmp.eq.f32.partialorder %v211_v23, %v217_v29  ;;  %v229_v31 = vshra.s32 %v227_v30, 16  ;;  %v228_v38 = vand.u32 65535, %v227_v30 }
 0x33e   :  { %v224_v32 = vsel %vm220_vm1, %v791_v51, 256  ;;  %v225_v33 = vsel %vm221_vm2, %v794_v52, 256 }
 0x33f   :  { %vm242_vm3 = vcmp.lt.s32.totalorder %v224_v32, %v225_v33  ;;  %v231_v34 = vcvt.s32.f32 %v229_v31  ;;  %v230_v40 = vcvt.s32.f32 %v228_v38 }
 0x340   :  { %v243_v35 = vsel %vm242_vm3, %v224_v32, %v225_v33 }
 0x341   :  { %232 = vmin.xlane.f32.xlu0 %v231_v34  ;;  %v245_v36 = vshra.s32 %v243_v35, 16  ;;  %v244_v43 = vand.u32 65535, %v243_v35 }
 0x343   :  { %v247_v37 = vcvt.s32.f32 %v245_v36  ;;  %v246_v46 = vcvt.s32.f32 %v244_v43 }
 0x345   :  { %248 = vmin.xlane.f32.xlu1 %v247_v37 }
 0x3ce   :  { %v233_v39 = vpop.xlane.xlu0 %232 }
 0x3cf   :  { %vm234_vm4 = vcmp.eq.f32.partialorder %v231_v34, %v233_v39  ;;  %v239_v50 = vcvt.f32.s32 %v233_v39 }
 0x3d0   :  { %v235_v44 = vsel %vm234_vm4, %v230_v40, inf }
 0x3d1   :  { %236 = vmin.xlane.f32.xlu0 %v235_v44  ;;  %v240_v54 = vshll.u32 %v239_v50, 16 }
 0x3d2   :  { %v249_v45 = vpop.xlane.xlu1 %248 }
 0x3d3   :  { %vm250_vm5 = vcmp.eq.f32.partialorder %v247_v37, %v249_v45  ;;  %v255_v55 = vcvt.f32.s32 %v249_v45 }
 0x3d4   :  { %v251_v47 = vsel %vm250_vm5, %v246_v46, inf }
 0x3d5   :  { %252 = vmin.xlane.f32.xlu1 %v251_v47  ;;  %v256_v61 = vshll.u32 %v255_v55, 16 }
 0x45e   :  { %v237_v53 = vpop.xlane.xlu0 %236 }
 0x45f   :  { %v238_v56 = vcvt.f32.s32 %v237_v53 }
 0x461   :  { %v241_v57 = vadd.s32 %v240_v54, %v238_v56 }
 0x462   :  { %v253_v60 = vpop.xlane.xlu1 %252 }
 0x463   :  { %vm258_vm6 = vcmp.eq.s32.totalorder %v791_v51, %v241_v57  ;;  %vm259_vm7 = vcmp.eq.s32.totalorder %v794_v52, %v241_v57  ;;  %v254_v62 = vcvt.f32.s32 %v253_v60 }
 0x464   :  { %v836_v63 = vsel %vm258_vm6, -1.0, %v208_v18  ;;  %v267_v0 = vsel %vm259_vm7, -1.0, %v209_v19  ;;  %v263_v1 = vsel %vm259_vm7, %v209_v19, %v205_v59  ;;  %v262_v2 = vsel %vm258_vm6, %v208_v18, %v204_v58 }
 0x465   :  { %v257_v3 = vadd.s32 %v256_v61, %v254_v62  ;;  %v270_v4 = vmax.f32 %v836_v63, %v267_v0 }
 0x467   :  { %vm260_vm8 = vcmp.eq.s32.totalorder %v791_v51, %v257_v3  ;;  %vm261_vm9 = vcmp.eq.s32.totalorder %v794_v52, %v257_v3  ;;  %271 = vmax.xlane.f32.xlu0 %v270_v4  ;;  %v398_v3 = vld [vmem:[%s1044_s4 + $0x80] sm:$0xff]  ;;  %v399_v4 = vld [vmem:[%s1044_s4 + $0x88] sm:$0xff] }
 0x468   :  { %v268_v5 = vsel %vm260_vm8, -1.0, %v817_v22  ;;  %v269_v6 = vsel %vm261_vm9, -1.0, %v211_v23  ;;  %v265_v7 = vsel %vm261_vm9, %v211_v23, %v207_v42  ;;  %v264_v8 = vsel %vm260_vm8, %v817_v22, %v206_v41  ;;  %v382_v41 = vld [vmem:[%s1044_s4] sm:$0xff] }
 0x469   :  { %v273_v9 = vmax.f32 %v268_v5, %v269_v6  ;;  %v584_v42 = vpack.c.bf16 %v399_v4, %v398_v3  ;;  %v396_v3 = vld [vmem:[%s1044_s4 + $0x70] sm:$0xff]  ;;  %v397_v4 = vld [vmem:[%s1044_s4 + $0x78] sm:$0xff] }
 0x46b   :  { %274 = vmax.xlane.f32.xlu1 %v273_v9  ;;  %585 = vmatprep.subr.bf16.mxu1 %v584_v42 }
 0x4f4   :  { %v272_v10 = vpop.xlane.xlu0 %271 }
 0x4f5   :  { %vm276_vm10 = vcmp.eq.f32.partialorder %v836_v63, %v272_v10  ;;  %vm277_vm11 = vcmp.eq.f32.partialorder %v267_v0, %v272_v10  ;;  %v384_v10 = vld [vmem:[%s1044_s4 + $0x10] sm:$0xff] }
 0x4f6   :  { %v280_v48 = vsel %vm276_vm10, %v791_v51, 256  ;;  %v281_v49 = vsel %vm277_vm11, %v794_v52, 256 }
 0x4f7   :  { %vm284_vm12 = vcmp.lt.s32.totalorder %v280_v48, %v281_v49 }
 0x4f8   :  { %v275_v11 = vpop.xlane.xlu1 %274  ;;  %v285_v12 = vsel %vm284_vm12, %v280_v48, %v281_v49  ;;  %v385_v48 = vld [vmem:[%s1044_s4 + $0x18] sm:$0xff]  ;;  %v402_v49 = vld [vmem:[%s1044_s4 + $0xa0] sm:$0xff] }
 0x4f9   :  { %vm278_vm13 = vcmp.eq.f32.partialorder %v268_v5, %v275_v11  ;;  %vm279_vm14 = vcmp.eq.f32.partialorder %v269_v6, %v275_v11  ;;  %v287_v13 = vshra.s32 %v285_v12, 16  ;;  %v286_v20 = vand.u32 65535, %v285_v12  ;;  %v403_v11 = vld [vmem:[%s1044_s4 + $0xa8] sm:$0xff] }
 0x4fa   :  { %v282_v14 = vsel %vm278_vm13, %v791_v51, 256  ;;  %v283_v15 = vsel %vm279_vm14, %v794_v52, 256  ;;  %v590_v12 = vpack.c.bf16 %v385_v48, %v384_v10 }
 0x4fb   :  { %vm300_vm15 = vcmp.lt.s32.totalorder %v282_v14, %v283_v15  ;;  %v289_v16 = vcvt.s32.f32 %v287_v13  ;;  %v288_v22 = vcvt.s32.f32 %v286_v20  ;;  %v592_v13 = vpack.c.bf16 %v403_v11, %v402_v49  ;;  %v388_v20 = vld [vmem:[%s1044_s4 + $0x30] sm:$0xff] }
 0x4fc   :  { %v301_v17 = vsel %vm300_vm15, %v282_v14, %v283_v15  ;;  %v386_v14 = vld [vmem:[%s1044_s4 + $0x20] sm:$0xff]  ;;  %v387_v15 = vld [vmem:[%s1044_s4 + $0x28] sm:$0xff] }
 0x4fd   :  { %290 = vmin.xlane.f32.xlu0 %v289_v16  ;;  %v303_v18 = vshra.s32 %v301_v17, 16  ;;  %v302_v23 = vand.u32 65535, %v301_v17  ;;  %v405_v17 = vld [vmem:[%s1044_s4 + $0xb8] sm:$0xff] }
 0x4ff   :  { %v305_v19 = vcvt.s32.f32 %v303_v18  ;;  %v304_v27 = vcvt.s32.f32 %v302_v23  ;;  %v594_v18 = vpack.c.bf16 %v387_v15, %v386_v14  ;;  %v407_v23 = vld [vmem:[%s1044_s4 + $0xc8] sm:$0xff] }
 0x501   :  { %306 = vmin.xlane.f32.xlu1 %v305_v19 }
 0x58a   :  { %v291_v21 = vpop.xlane.xlu0 %290 }
 0x58b   :  { %vm292_vm1 = vcmp.eq.f32.partialorder %v289_v16, %v291_v21  ;;  %v297_v29 = vcvt.f32.s32 %v291_v21  ;;  %v404_v16 = vld [vmem:[%s1044_s4 + $0xb0] sm:$0xff]  ;;  %v389_v21 = vld [vmem:[%s1044_s4 + $0x38] sm:$0xff] }
 0x58c   :  { %v293_v24 = vsel %vm292_vm1, %v288_v22, inf  ;;  %v406_v22 = vld [vmem:[%s1044_s4 + $0xc0] sm:$0xff] }
 0x58d   :  { %294 = vmin.xlane.f32.xlu0 %v293_v24  ;;  %v298_v31 = vshll.u32 %v297_v29, 16  ;;  %v598_v24 = vpack.c.bf16 %v389_v21, %v388_v20  ;;  %v408_v29 = vld [vmem:[%s1044_s4 + $0xd0] sm:$0xff] }
 0x58e   :  { %v307_v25 = vpop.xlane.xlu1 %306 }
 0x58f   :  { %vm308_vm2 = vcmp.eq.f32.partialorder %v305_v19, %v307_v25  ;;  %v313_v32 = vcvt.f32.s32 %v307_v25  ;;  %v596_v19 = vpack.c.bf16 %v405_v17, %v404_v16  ;;  %v600_v25 = vpack.c.bf16 %v407_v23, %v406_v22 }
 0x590   :  { %v309_v28 = vsel %vm308_vm2, %v304_v27, inf  ;;  %v390_v27 = vld [vmem:[%s1044_s4 + $0x40] sm:$0xff] }
 0x591   :  { %310 = vmin.xlane.f32.xlu1 %v309_v28  ;;  %v314_v36 = vshll.u32 %v313_v32, 16  ;;  %v391_v28 = vld [vmem:[%s1044_s4 + $0x48] sm:$0xff] }
 0x61a   :  { %v295_v30 = vpop.xlane.xlu0 %294 }
 0x61b   :  { %v296_v33 = vcvt.f32.s32 %v295_v30  ;;  %v409_v30 = vld [vmem:[%s1044_s4 + $0xd8] sm:$0xff] }
 0x61c   :  { %v604_v32 = vpack.c.bf16 %v409_v30, %v408_v29 }
 0x61d   :  { %v299_v34 = vadd.s32 %v298_v31, %v296_v33  ;;  %v602_v31 = vpack.c.bf16 %v391_v28, %v390_v27  ;;  %v392_v33 = vld [vmem:[%s1044_s4 + $0x50] sm:$0xff] }
 0x61e   :  { %v311_v35 = vpop.xlane.xlu1 %310 }
 0x61f   :  { %vm316_vm3 = vcmp.eq.s32.totalorder %v791_v51, %v299_v34  ;;  %vm317_vm4 = vcmp.eq.s32.totalorder %v794_v52, %v299_v34  ;;  %v312_v37 = vcvt.f32.s32 %v311_v35  ;;  %v393_v34 = vld [vmem:[%s1044_s4 + $0x58] sm:$0xff]  ;;  %v410_v35 = vld [vmem:[%s1044_s4 + $0xe0] sm:$0xff] }
 0x620   :  { %v857_v38 = vsel %vm316_vm3, -1.0, %v836_v63  ;;  %v859_v39 = vsel %vm317_vm4, -1.0, %v267_v0  ;;  %v861_v40 = vsel %vm317_vm4, %v267_v0, %v263_v1  ;;  %v864_v43 = vsel %vm316_vm3, %v836_v63, %v262_v2 }
 0x621   :  { %v315_v44 = vadd.s32 %v314_v36, %v312_v37  ;;  %v328_v45 = vmax.f32 %v857_v38, %v859_v39  ;;  %v411_v36 = vld [vmem:[%s1044_s4 + $0xe8] sm:$0xff]  ;;  %v606_v37 = vpack.c.bf16 %v393_v34, %v392_v33 }
 0x623   :  { %vm318_vm5 = vcmp.eq.s32.totalorder %v791_v51, %v315_v44  ;;  %vm319_vm6 = vcmp.eq.s32.totalorder %v794_v52, %v315_v44  ;;  %329 = vmax.xlane.f32.xlu0 %v328_v45  ;;  %v608_v44 = vpack.c.bf16 %v411_v36, %v410_v35 }
 0x624   :  { %v870_v46 = vsel %vm318_vm5, -1.0, %v268_v5  ;;  %v872_v47 = vsel %vm319_vm6, -1.0, %v269_v6  ;;  %v874_v50 = vsel %vm319_vm6, %v269_v6, %v265_v7  ;;  %v876_v53 = vsel %vm318_vm5, %v268_v5, %v264_v8  ;;  %v383_v5 = vld [vmem:[%s1044_s4 + $0x8] sm:$0xff]  ;;  %v400_v6 = vld [vmem:[%s1044_s4 + $0x90] sm:$0xff]  ;;  %v401_v7 = vld [vmem:[%s1044_s4 + $0x98] sm:$0xff] }
 0x625   :  { %v331_v54 = vmax.f32 %v870_v46, %v872_v47  ;;  %v586_v8 = vpack.c.bf16 %v383_v5, %v382_v41  ;;  %v588_v9 = vpack.c.bf16 %v401_v7, %v400_v6  ;;  %v614_v41 = vpack.c.bf16 %v397_v4, %v396_v3 }
 0x627   :  { %332 = vmax.xlane.f32.xlu1 %v331_v54  ;;  %587 = vmatpush3.bf16.msra.mxu1 %v586_v8 }
 0x628   :  { %589 = vmatprep.subr.bf16.mxu1 %v588_v9 }
 0x62b   :  { %591 = vmatpush3.bf16.msra.mxu1 %v590_v12 }
 0x62c   :  { %593 = vmatprep.subr.bf16.mxu1 %v592_v13 }
 0x62f   :  { %595 = vmatpush3.bf16.msra.mxu1 %v594_v18 }
 0x630   :  { %597 = vmatprep.subr.bf16.mxu1 %v596_v19 }
 0x633   :  { %599 = vmatpush3.bf16.msra.mxu1 %v598_v24 }
 0x634   :  { %601 = vmatprep.subr.bf16.mxu1 %v600_v25 }
 0x637   :  { %603 = vmatpush3.bf16.msra.mxu1 %v602_v31 }
 0x638   :  { %605 = vmatprep.subr.bf16.mxu1 %v604_v32 }
 0x63b   :  { %607 = vmatpush3.bf16.msra.mxu1 %v606_v37 }
 0x63c   :  { %609 = vmatprep.subr.bf16.mxu1 %v608_v44 }
 0x6b0   :  { %v330_v55 = vpop.xlane.xlu0 %329 }
 0x6b1   :  { %vm334_vm7 = vcmp.eq.f32.partialorder %v857_v38, %v330_v55  ;;  %vm335_vm8 = vcmp.eq.f32.partialorder %v859_v39, %v330_v55 }
 0x6b2   :  { %v338_v56 = vsel %vm334_vm7, %v791_v51, 256  ;;  %v339_v57 = vsel %vm335_vm8, %v794_v52, 256 }
 0x6b3   :  { %vm342_vm9 = vcmp.lt.s32.totalorder %v338_v56, %v339_v57 }
 0x6b4   :  { %v333_v58 = vpop.xlane.xlu1 %332  ;;  %v884_v59 = vsel %vm342_vm9, %v338_v56, %v339_v57 }
 0x6b5   :  { %vm336_vm10 = vcmp.eq.f32.partialorder %v870_v46, %v333_v58  ;;  %vm337_vm11 = vcmp.eq.f32.partialorder %v872_v47, %v333_v58  ;;  %v345_v60 = vshra.s32 %v884_v59, 16  ;;  %v344_v45 = vand.u32 65535, %v884_v59  ;;  %v395_v59 = vld [vmem:[%s1044_s4 + $0x68] sm:$0xff] }
 0x6b6   :  { %v340_v61 = vsel %vm336_vm10, %v791_v51, 256  ;;  %v341_v62 = vsel %vm337_vm11, %v794_v52, 256 }
 0x6b7   :  { %vm358_vm12 = vcmp.lt.s32.totalorder %v340_v61, %v341_v62  ;;  %v891_v63 = vcvt.s32.f32 %v345_v60  ;;  %v346_v55 = vcvt.s32.f32 %v344_v45 }
 0x6b8   :  { %v893_v0 = vsel %vm358_vm12, %v340_v61, %v341_v62  ;;  %v394_v62 = vld [vmem:[%s1044_s4 + $0x60] sm:$0xff] }
 0x6b9   :  { %348 = vmin.xlane.f32.xlu0 %v891_v63  ;;  %v361_v1 = vshra.s32 %v893_v0, 16  ;;  %v360_v56 = vand.u32 65535, %v893_v0  ;;  %v413_v0 = vld [vmem:[%s1044_s4 + $0xf8] sm:$0xff] }
 0x6bb   :  { %v897_v2 = vcvt.s32.f32 %v361_v1  ;;  %v362_v60 = vcvt.s32.f32 %v360_v56  ;;  %v610_v1 = vpack.c.bf16 %v395_v59, %v394_v62 }
 0x6bd   :  { %364 = vmin.xlane.f32.xlu1 %v897_v2  ;;  %611 = vmatpush3.bf16.msra.mxu1 %v610_v1 }
 0x746   :  { %v349_v54 = vpop.xlane.xlu0 %348 }
 0x747   :  { %vm350_vm13 = vcmp.eq.f32.partialorder %v891_v63, %v349_v54  ;;  %v412_v63 = vld [vmem:[%s1044_s4 + $0xf0] sm:$0xff]  ;;  %v355_v42 = vcvt.f32.s32 %v349_v54  ;;  %s672_s4 = smov [#allocation4]  }
 0x748   :  { %v351_v57 = vsel %vm350_vm13, %v346_v55, inf  ;;  %s512_s17 = sshll.u32 %s672_s4, 4  ;;  %s513_s17 = int_to_ptr.vmem [resolvable:$true] %s512_s17 }
 0x749   :  { %352 = vmin.xlane.f32.xlu0 %v351_v57  ;;  %v356_v6 = vshll.u32 %v355_v42, 16  ;;  %s623_s18 = scalar_lea.vmem %s513_s17, 512  ;;  %p628_p1 = scmp.lt.s32.totalorder %s513_s17, %s513_s17 }
 0x74a   :  { %v365_v58 = vpop.xlane.xlu1 %364  ;;  %p624_p0 = scmp.ne.s32.totalorder %s513_s17, %s623_s18  ;;  %p629_p2 = scmp.lt.s32.totalorder %s623_s18, %s623_s18 }
 0x74b   :  { %vm366_vm14 = vcmp.eq.f32.partialorder %v897_v2, %v365_v58  ;;  %v612_v2 = vpack.c.bf16 %v413_v0, %v412_v63  ;;  %v371_v7 = vcvt.f32.s32 %v365_v58 }
 0x74c   :  { %v367_v61 = vsel %vm366_vm14, %v362_v60, inf  ;;  %p630_p3 = por %p629_p2, %p628_p1 }
 0x74d   :  { %368 = vmin.xlane.f32.xlu1 %v367_v61  ;;  %613 = vmatprep.subr.bf16.mxu1 %v612_v2  ;;  %v372_v48 = vshll.u32 %v371_v7, 16 }
 0x74e   :  { %615 = vmatpush3.bf16.msra.mxu1 %v614_v41  ;;  %p631_p4 = pnand %p630_p3, %p624_p0 }
 0x7d6   :  { %v353_v5 = vpop.xlane.xlu0 %352 }
 0x7d7   :  { %v354_v8 = vcvt.f32.s32 %v353_v5 }
 0x7d9   :  { %v357_v9 = vadd.s32 %v356_v6, %v354_v8 }
 0x7da   :  { %v369_v10 = vpop.xlane.xlu1 %368 }
 0x7db   :  { %vm374_vm15 = vcmp.eq.s32.totalorder %v791_v51, %v357_v9  ;;  %v370_v49 = vcvt.f32.s32 %v369_v10  ;;  %vm375_vm1 = vcmp.eq.s32.totalorder %v794_v52, %v357_v9 }
 0x7dc   :  { %v379_v11 = vsel %vm375_vm1, %v859_v39, %v861_v40  ;;  %v378_v12 = vsel %vm374_vm15, %v857_v38, %v864_v43 }
 0x7dd   :  { %v373_v13 = vadd.s32 %v372_v48, %v370_v49  ;;  %478 = vmatprep.mubr.f32.mxu1 %v379_v11  ;;  %490 = vst [vmem:[#allocation4 + $0x8] sm:$0xff] %v379_v11  ;;  %489 = vst [vmem:[#allocation4] sm:$0xff] %v378_v12 }
 0x7de   :  { %479 = vmatmul.mubr.f32.vlgmr.msra.gmra.mrb[0].mxu1 %v378_v12 }
 0x7df   :  { %vm376_vm2 = vcmp.eq.s32.totalorder %v791_v51, %v373_v13  ;;  %vm377_vm3 = vcmp.eq.s32.totalorder %v794_v52, %v373_v13 }
 0x7e0   :  { %v381_v14 = vsel %vm377_vm3, %v872_v47, %v874_v50  ;;  %v380_v15 = vsel %vm376_vm2, %v870_v46, %v876_v53 }
 0x7e1   :  { %483 = vmatprep.mubr.f32.mxu1 %v381_v14  ;;  %492 = vst [vmem:[#allocation4 + $0x18] sm:$0xff] %v381_v14  ;;  %491 = vst [vmem:[#allocation4 + $0x10] sm:$0xff] %v380_v15 }
 0x7e2   :  { %484 = vmatmul.mubr.f32.gmra.mrb[2].mxu1 %v380_v15 }
 0x7e3   :  { %634 = shalt.err (!%p631_p4)
}
 0x7e4   :  { %s635_s21 = scalar_lea.hbm %s1046_s6, 512 }
 0x7e5   :  { %p636_p5 = scmp.ne.s32.totalorder %s1046_s6, %s635_s21  ;;  %p639_p6 = scmp.lt.u32.totalorder %s635_s21, %s1046_s6 }
 0x7e7   :  { %p641_p7 = pnand %p639_p6, %p636_p5 }
 0x7e9   :  { %644 = shalt.err (!%p641_p7)
}
 0x7ea   :  { %s673_s26 = smov 256   ;;  %s674_s27 = smov 16  }
 0x7eb   :  { %518 = dma.vmem_to_hbm [thread:$0]  %s513_s17, 512, %s1046_s6, [#allocation5], %s673_s26, %s673_s26, %s674_s27  }
 0x7ec   :  { %s675_s30 = smov [#allocation2]  }
 0x7ed   :  { %s500_s7 = sshll.u32 %s675_s30, 4  ;;  %s501_s7 = int_to_ptr.vmem [resolvable:$true] %s500_s7 }
 0x7ee   :  { %s645_s8 = scalar_lea.vmem %s501_s7, 256  ;;  %p650_p9 = scmp.lt.s32.totalorder %s501_s7, %s501_s7 }
 0x7ef   :  { %p646_p8 = scmp.ne.s32.totalorder %s501_s7, %s645_s8  ;;  %p651_p10 = scmp.lt.s32.totalorder %s645_s8, %s645_s8 }
 0x7f1   :  { %p652_p11 = por %p651_p10, %p650_p9 }
 0x7f3   :  { %p653_p12 = pnand %p652_p11, %p646_p8 }
 0x8b1   :  { %v562_v51 = vpop.f32.mrb[0].mxu1 }
 0x8b2   :  { %v563_v52 = vpop.f32.mrb[1].mxu1 }
 0x8b3   :  { %v564_v38 = vadd.f32 %v563_v52, %v562_v51 }
 0x8b5   :  { %v481_v39 = vadd.f32 %v564_v38, %v767_v26  ;;  %v565_v40 = vpop.f32.mrb[2].mxu1 }
 0x8b6   :  { %v566_v43 = vpop.f32.mrb[3].mxu1 }
 0x8b7   :  { %493 = vst.msk [vmem:[#allocation2] sm:$0xff] %vm63_vm0, %v481_v39  ;;  %v567_v46 = vadd.f32 %v566_v43, %v565_v40 }
 0x8b9   :  { %v486_v47 = vadd.f32 %v567_v46, %v767_v26 }
 0x8bb   :  { %494 = vst.msk [vmem:[#allocation2 + $0x8] sm:$0xff] %vm63_vm0, %v486_v47 }
 0x8bc   :  { %656 = shalt.err (!%p653_p12)
}
 0x8bd   :  { %s657_s10 = scalar_lea.hbm %s1045_s5, 256 }
 0x8be   :  { %p658_p13 = scmp.ne.s32.totalorder %s1045_s5, %s657_s10  ;;  %p661_p0 = scmp.lt.u32.totalorder %s657_s10, %s1045_s5 }
 0x8c0   :  { %p663_p1 = pnand %p661_p0, %p658_p13 }
 0x8c2   :  { %666 = shalt.err (!%p663_p1)
}
 0x8c3   :  { %s676_s11 = smov 128   ;;  %s677_s12 = smov 8  }
 0x8c4   :  { %506 = dma.vmem_to_hbm [thread:$0]  %s501_s7, 256, %s1045_s5, [#allocation3], %s676_s11, %s676_s11, %s677_s12  }
 0x8c5   :  { %667 = dma.done.wait [#allocation3], 256  }
 0x8c6   :  { %668 = vsyncadd [#allocation3], 4294967040 }
 0x8c7   :  { %669 = dma.done.wait [#allocation5], 512  }
 0x8c8   :  { %670 = vsyncadd [#allocation5], 4294966784 }
 0x8c9   :  { %525 = vsyncpa [#allocation3], 1 }
 0x8ca   :  { %526 = vsyncpa [#allocation5], 1 }

// kernel: tpu_custom_call.1
= control target key start
LH: loop header
LB: loop body
LE: loop exit
PB: predicated region body
PF: predicated region fallthrough
CT: control target
= control target key end

     0   :  { %12 = vsyncpa [#allocation3], 0  ;;  %v671_v7 = vmov 0.0   ;;  %s1040_s0 = inlined_call_operand.vmem [shape: f32[16,64], index: 0, kind: input, shape index: {}]   ;;  %s1041_s1 = inlined_call_operand.vmem [shape: f32[1,64], index: 1, kind: input, shape index: {}]   ;;  %s1042_s2 = inlined_call_operand.vmem [shape: f32[64,256], index: 2, kind: input, shape index: {}]   ;;  %s1043_s3 = inlined_call_operand.vmem [shape: f32[1,256], index: 3, kind: input, shape index: {}]   ;;  %s1044_s4 = inlined_call_operand.vmem [shape: f32[256,64], index: 4, kind: input, shape index: {}]   ;;  %s1045_s5 = inlined_call_operand.hbm [shape: f32[16,64], index: 5, kind: output, shape index: {0}]   ;;  %s1046_s6 = inlined_call_operand.hbm [shape: f32[16,256], index: 6, kind: output, shape index: {1}]  }
   0x1   :  { %v36_v0 = vld [vmem:[%s1042_s2 + $0x8] sm:$0xff]  ;;  %v38_v1 = vld [vmem:[%s1042_s2 + $0x18] sm:$0xff]  ;;  %v35_v2 = vld [vmem:[%s1042_s2] sm:$0xff]  ;;  %134 = vmatprep.mubr.f32.mxu0 %v671_v7 }
   0x2   :  { %v568_v3 = vpack.c.bf16 %v38_v1, %v36_v0  ;;  %v37_v4 = vld [vmem:[%s1042_s2 + $0x10] sm:$0xff]  ;;  %v40_v5 = vld [vmem:[%s1042_s2 + $0x28] sm:$0xff]  ;;  %v42_v6 = vld [vmem:[%s1042_s2 + $0x38] sm:$0xff] }
   0x3   :  { %v570_v8 = vpack.c.bf16 %v37_v4, %v35_v2  ;;  %v572_v9 = vpack.c.bf16 %v42_v6, %v40_v5  ;;  %v39_v10 = vld [vmem:[%s1042_s2 + $0x20] sm:$0xff]  ;;  %v41_v11 = vld [vmem:[%s1042_s2 + $0x30] sm:$0xff]  ;;  %v44_v12 = vld [vmem:[%s1042_s2 + $0x48] sm:$0xff] }
   0x4   :  { %569 = vmatprep.subr.bf16.mxu0 %v568_v3  ;;  %v46_v13 = vld [vmem:[%s1042_s2 + $0x58] sm:$0xff]  ;;  %v574_v14 = vpack.c.bf16 %v41_v11, %v39_v10  ;;  %v43_v16 = vld [vmem:[%s1042_s2 + $0x40] sm:$0xff]  ;;  %v45_v17 = vld [vmem:[%s1042_s2 + $0x50] sm:$0xff] }
   0x5   :  { %571 = vmatpush1.bf16.msra.mxu0 %v570_v8  ;;  %v576_v15 = vpack.c.bf16 %v46_v13, %v44_v12  ;;  %v48_v18 = vld [vmem:[%s1042_s2 + $0x68] sm:$0xff]  ;;  %v50_v19 = vld [vmem:[%s1042_s2 + $0x78] sm:$0xff] }
   0x6   :  { %573 = vmatprep.subr.bf16.mxu0 %v572_v9 }
   0x7   :  { %13 = vsyncpa [#allocation5], 0  ;;  %v578_v20 = vpack.c.bf16 %v45_v17, %v43_v16  ;;  %v580_v21 = vpack.c.bf16 %v50_v19, %v48_v18  ;;  %v47_v22 = vld [vmem:[%s1042_s2 + $0x60] sm:$0xff]  ;;  %v49_v23 = vld [vmem:[%s1042_s2 + $0x70] sm:$0xff]  ;;  %vm63_vm0 = vcmask 523264   ;;  %v53_v30 = vlaneseq }
   0x8   :  { %v582_v24 = vpack.c.bf16 %v49_v23, %v47_v22  ;;  %v24_v25 = vld [vmem:[%s1040_s0] sm:$0xff]  ;;  %v25_v28 = vld [vmem:[%s1040_s0 + $0x8] sm:$0xff] }
   0x9   :  { %575 = vmatpush1.bf16.msra.mxu0 %v574_v14  ;;  %v767_v26 = vld [vmem:[%s1041_s1] ss:$0 sm:$0xff]  ;;  %v54_v31 = vshrl.u32 %v53_v30, 7  ;;  %v791_v51 = vand.u32 127, %v53_v30 }
   0xa   :  { %577 = vmatprep.subr.bf16.mxu0 %v576_v15  ;;  %v33_v27 = vsub.f32 %v24_v25, %v767_v26  ;;  %v34_v29 = vsub.f32 %v25_v28, %v767_v26  ;;  %v51_v33 = vld [vmem:[%s1043_s3] sm:$0x3] }
   0xb   :  { %v55_v32 = vsub.s32 0, %v54_v31  ;;  %v59_v34 = vsub.s32 1, %v54_v31  ;;  %v794_v52 = vadd.s32 128, %v791_v51 }
   0xd   :  { %579 = vmatpush1.bf16.msra.mxu0 %v578_v20  ;;  %v56_v35 = vrot.slane %v51_v33, %v55_v32  ;;  %v60_v36 = vrot.slane %v51_v33, %v59_v34 }
   0xe   :  { %581 = vmatprep.subr.bf16.mxu0 %v580_v21 }
  0x11   :  { %583 = vmatpush1.bf16.msra.mxu0 %v582_v24 }
  0x14   :  { %528 = vmatmul.mubr.msk.f32.vlgmr.msra.gmra.mrb[0].mxu0 %vm63_vm0, %v33_v27 }
  0x15   :  { %140 = vmatprep.mubr.f32.mxu0 %v671_v7 }
  0x18   :  { %529 = vmatmul.mubr.msk.f32.gmra.mrb[2].mxu0 %vm63_vm0, %v34_v29 }
  0xe7   :  { %v136_v37 = vpop.f32.mrb[0].mxu0 }
  0xe8   :  { %v137_v38 = vadd.f32 %v136_v37, %v56_v35  ;;  %v138_v39 = vpop.f32.mrb[1].mxu0 }
  0xe9   :  { %v139_v40 = vadd.f32 %v138_v39, %v60_v36 }
  0xea   :  { %v779_v41 = vmax.f32 %v137_v38, 0.0 }
  0xeb   :  { %v781_v42 = vmax.f32 %v139_v40, 0.0  ;;  %v142_v43 = vpop.f32.mrb[2].mxu0 }
  0xec   :  { %v143_v44 = vadd.f32 %v142_v43, %v56_v35  ;;  %v144_v45 = vpop.f32.mrb[3].mxu0 }
  0xed   :  { %v145_v46 = vadd.f32 %v144_v45, %v60_v36  ;;  %v154_v47 = vmax.f32 %v779_v41, %v781_v42 }
  0xee   :  { %v785_v48 = vmax.f32 %v143_v44, 0.0 }
  0xef   :  { %v787_v49 = vmax.f32 %v145_v46, 0.0  ;;  %155 = vmax.xlane.f32.xlu0 %v154_v47 }
  0xf1   :  { %v157_v50 = vmax.f32 %v785_v48, %v787_v49 }
  0xf3   :  { %158 = vmax.xlane.f32.xlu0 %v157_v50 }
 0x17c   :  { %v156_v53 = vpop.xlane.xlu0 %155 }
 0x17d   :  { %vm160_vm1 = vcmp.eq.f32.partialorder %v779_v41, %v156_v53  ;;  %vm161_vm2 = vcmp.eq.f32.partialorder %v781_v42, %v156_v53 }
 0x17e   :  { %v164_v54 = vsel %vm160_vm1, %v791_v51, 256  ;;  %v165_v55 = vsel %vm161_vm2, %v794_v52, 256 }
 0x17f   :  { %vm168_vm3 = vcmp.lt.s32.totalorder %v164_v54, %v165_v55 }
 0x180   :  { %v159_v56 = vpop.xlane.xlu0 %158  ;;  %v169_v57 = vsel %vm168_vm3, %v164_v54, %v165_v55 }
 0x181   :  { %vm162_vm4 = vcmp.eq.f32.partialorder %v785_v48, %v159_v56  ;;  %vm163_vm5 = vcmp.eq.f32.partialorder %v787_v49, %v159_v56  ;;  %v171_v58 = vshra.s32 %v169_v57, 16  ;;  %v170_v1 = vand.u32 65535, %v169_v57 }
 0x182   :  { %v166_v59 = vsel %vm162_vm4, %v791_v51, 256  ;;  %v167_v60 = vsel %vm163_vm5, %v794_v52, 256 }
 0x183   :  { %vm184_vm6 = vcmp.lt.s32.totalorder %v166_v59, %v167_v60  ;;  %v173_v61 = vcvt.s32.f32 %v171_v58  ;;  %v172_v3 = vcvt.s32.f32 %v170_v1 }
 0x184   :  { %v185_v62 = vsel %vm184_vm6, %v166_v59, %v167_v60 }
 0x185   :  { %174 = vmin.xlane.f32.xlu1 %v173_v61  ;;  %v187_v63 = vshra.s32 %v185_v62, 16  ;;  %v186_v4 = vand.u32 65535, %v185_v62 }
 0x187   :  { %v189_v0 = vcvt.s32.f32 %v187_v63  ;;  %v188_v7 = vcvt.s32.f32 %v186_v4 }
 0x189   :  { %190 = vmin.xlane.f32.xlu1 %v189_v0 }
 0x212   :  { %v175_v2 = vpop.xlane.xlu1 %174 }
 0x213   :  { %vm176_vm7 = vcmp.eq.f32.partialorder %v173_v61, %v175_v2  ;;  %v181_v9 = vcvt.f32.s32 %v175_v2 }
 0x214   :  { %v177_v5 = vsel %vm176_vm7, %v172_v3, inf }
 0x215   :  { %178 = vmin.xlane.f32.xlu0 %v177_v5  ;;  %v182_v11 = vshll.u32 %v181_v9, 16 }
 0x216   :  { %v191_v6 = vpop.xlane.xlu1 %190 }
 0x217   :  { %vm192_vm8 = vcmp.eq.f32.partialorder %v189_v0, %v191_v6  ;;  %v197_v12 = vcvt.f32.s32 %v191_v6 }
 0x218   :  { %v193_v8 = vsel %vm192_vm8, %v188_v7, inf }
 0x219   :  { %194 = vmin.xlane.f32.xlu1 %v193_v8  ;;  %v198_v16 = vshll.u32 %v197_v12, 16 }
 0x2a2   :  { %v179_v10 = vpop.xlane.xlu0 %178 }
 0x2a3   :  { %v180_v13 = vcvt.f32.s32 %v179_v10 }
 0x2a5   :  { %v183_v14 = vadd.s32 %v182_v11, %v180_v13 }
 0x2a6   :  { %v195_v15 = vpop.xlane.xlu1 %194 }
 0x2a7   :  { %vm200_vm9 = vcmp.eq.s32.totalorder %v791_v51, %v183_v14  ;;  %vm201_vm10 = vcmp.eq.s32.totalorder %v794_v52, %v183_v14  ;;  %v196_v17 = vcvt.f32.s32 %v195_v15 }
 0x2a8   :  { %v208_v18 = vsel %vm200_vm9, -1.0, %v779_v41  ;;  %v209_v19 = vsel %vm201_vm10, -1.0, %v781_v42  ;;  %v204_v58 = vsel %vm200_vm9, %v779_v41, 0.0  ;;  %v205_v59 = vsel %vm201_vm10, %v781_v42, 0.0 }
 0x2a9   :  { %v199_v20 = vadd.s32 %v198_v16, %v196_v17  ;;  %v212_v21 = vmax.f32 %v208_v18, %v209_v19 }
 0x2ab   :  { %vm202_vm11 = vcmp.eq.s32.totalorder %v791_v51, %v199_v20  ;;  %vm203_vm12 = vcmp.eq.s32.totalorder %v794_v52, %v199_v20  ;;  %213 = vmax.xlane.f32.xlu0 %v212_v21 }
 0x2ac   :  { %v817_v22 = vsel %vm202_vm11, -1.0, %v785_v48  ;;  %v211_v23 = vsel %vm203_vm12, -1.0, %v787_v49  ;;  %v206_v41 = vsel %vm202_vm11, %v785_v48, 0.0  ;;  %v207_v42 = vsel %vm203_vm12, %v787_v49, 0.0 }
 0x2ad   :  { %v215_v24 = vmax.f32 %v817_v22, %v211_v23 }
 0x2af   :  { %216 = vmax.xlane.f32.xlu1 %v215_v24 }
 0x338   :  { %v214_v25 = vpop.xlane.xlu0 %213 }
 0x339   :  { %vm218_vm13 = vcmp.eq.f32.partialorder %v208_v18, %v214_v25  ;;  %vm219_vm14 = vcmp.eq.f32.partialorder %v209_v19, %v214_v25 }
 0x33a   :  { %v222_v27 = vsel %vm218_vm13, %v791_v51, 256  ;;  %v223_v28 = vsel %vm219_vm14, %v794_v52, 256 }
 0x33b   :  { %vm226_vm15 = vcmp.lt.s32.totalorder %v222_v27, %v223_v28 }
 0x33c   :  { %v217_v29 = vpop.xlane.xlu1 %216  ;;  %v227_v30 = vsel %vm226_vm15, %v222_v27, %v223_v28 }
 0x33d   :  { %vm220_vm1 = vcmp.eq.f32.partialorder %v817_v22, %v217_v29  ;;  %vm221_vm2 = vcmp.eq.f32.partialorder %v211_v23, %v217_v29  ;;  %v229_v31 = vshra.s32 %v227_v30, 16  ;;  %v228_v38 = vand.u32 65535, %v227_v30 }
 0x33e   :  { %v224_v32 = vsel %vm220_vm1, %v791_v51, 256  ;;  %v225_v33 = vsel %vm221_vm2, %v794_v52, 256 }
 0x33f   :  { %vm242_vm3 = vcmp.lt.s32.totalorder %v224_v32, %v225_v33  ;;  %v231_v34 = vcvt.s32.f32 %v229_v31  ;;  %v230_v40 = vcvt.s32.f32 %v228_v38 }
 0x340   :  { %v243_v35 = vsel %vm242_vm3, %v224_v32, %v225_v33 }
 0x341   :  { %232 = vmin.xlane.f32.xlu0 %v231_v34  ;;  %v245_v36 = vshra.s32 %v243_v35, 16  ;;  %v244_v43 = vand.u32 65535, %v243_v35 }
 0x343   :  { %v247_v37 = vcvt.s32.f32 %v245_v36  ;;  %v246_v46 = vcvt.s32.f32 %v244_v43 }
 0x345   :  { %248 = vmin.xlane.f32.xlu1 %v247_v37 }
 0x3ce   :  { %v233_v39 = vpop.xlane.xlu0 %232 }
 0x3cf   :  { %vm234_vm4 = vcmp.eq.f32.partialorder %v231_v34, %v233_v39  ;;  %v239_v50 = vcvt.f32.s32 %v233_v39 }
 0x3d0   :  { %v235_v44 = vsel %vm234_vm4, %v230_v40, inf }
 0x3d1   :  { %236 = vmin.xlane.f32.xlu0 %v235_v44  ;;  %v240_v54 = vshll.u32 %v239_v50, 16 }
 0x3d2   :  { %v249_v45 = vpop.xlane.xlu1 %248 }
 0x3d3   :  { %vm250_vm5 = vcmp.eq.f32.partialorder %v247_v37, %v249_v45  ;;  %v255_v55 = vcvt.f32.s32 %v249_v45 }
 0x3d4   :  { %v251_v47 = vsel %vm250_vm5, %v246_v46, inf }
 0x3d5   :  { %252 = vmin.xlane.f32.xlu1 %v251_v47  ;;  %v256_v61 = vshll.u32 %v255_v55, 16 }
 0x45e   :  { %v237_v53 = vpop.xlane.xlu0 %236 }
 0x45f   :  { %v238_v56 = vcvt.f32.s32 %v237_v53 }
 0x461   :  { %v241_v57 = vadd.s32 %v240_v54, %v238_v56 }
 0x462   :  { %v253_v60 = vpop.xlane.xlu1 %252 }
 0x463   :  { %vm258_vm6 = vcmp.eq.s32.totalorder %v791_v51, %v241_v57  ;;  %vm259_vm7 = vcmp.eq.s32.totalorder %v794_v52, %v241_v57  ;;  %v254_v62 = vcvt.f32.s32 %v253_v60 }
 0x464   :  { %v836_v63 = vsel %vm258_vm6, -1.0, %v208_v18  ;;  %v267_v0 = vsel %vm259_vm7, -1.0, %v209_v19  ;;  %v263_v1 = vsel %vm259_vm7, %v209_v19, %v205_v59  ;;  %v262_v2 = vsel %vm258_vm6, %v208_v18, %v204_v58 }
 0x465   :  { %v257_v3 = vadd.s32 %v256_v61, %v254_v62  ;;  %v270_v4 = vmax.f32 %v836_v63, %v267_v0 }
 0x467   :  { %vm260_vm8 = vcmp.eq.s32.totalorder %v791_v51, %v257_v3  ;;  %vm261_vm9 = vcmp.eq.s32.totalorder %v794_v52, %v257_v3  ;;  %271 = vmax.xlane.f32.xlu0 %v270_v4  ;;  %v398_v3 = vld [vmem:[%s1044_s4 + $0x80] sm:$0xff]  ;;  %v399_v4 = vld [vmem:[%s1044_s4 + $0x88] sm:$0xff] }
 0x468   :  { %v268_v5 = vsel %vm260_vm8, -1.0, %v817_v22  ;;  %v269_v6 = vsel %vm261_vm9, -1.0, %v211_v23  ;;  %v265_v7 = vsel %vm261_vm9, %v211_v23, %v207_v42  ;;  %v264_v8 = vsel %vm260_vm8, %v817_v22, %v206_v41  ;;  %v382_v41 = vld [vmem:[%s1044_s4] sm:$0xff] }
 0x469   :  { %v273_v9 = vmax.f32 %v268_v5, %v269_v6  ;;  %v584_v42 = vpack.c.bf16 %v399_v4, %v398_v3  ;;  %v396_v3 = vld [vmem:[%s1044_s4 + $0x70] sm:$0xff]  ;;  %v397_v4 = vld [vmem:[%s1044_s4 + $0x78] sm:$0xff] }
 0x46b   :  { %274 = vmax.xlane.f32.xlu1 %v273_v9  ;;  %585 = vmatprep.subr.bf16.mxu1 %v584_v42 }
 0x4f4   :  { %v272_v10 = vpop.xlane.xlu0 %271 }
 0x4f5   :  { %vm276_vm10 = vcmp.eq.f32.partialorder %v836_v63, %v272_v10  ;;  %vm277_vm11 = vcmp.eq.f32.partialorder %v267_v0, %v272_v10  ;;  %v384_v10 = vld [vmem:[%s1044_s4 + $0x10] sm:$0xff] }
 0x4f6   :  { %v280_v48 = vsel %vm276_vm10, %v791_v51, 256  ;;  %v281_v49 = vsel %vm277_vm11, %v794_v52, 256 }
 0x4f7   :  { %vm284_vm12 = vcmp.lt.s32.totalorder %v280_v48, %v281_v49 }
 0x4f8   :  { %v275_v11 = vpop.xlane.xlu1 %274  ;;  %v285_v12 = vsel %vm284_vm12, %v280_v48, %v281_v49  ;;  %v385_v48 = vld [vmem:[%s1044_s4 + $0x18] sm:$0xff]  ;;  %v402_v49 = vld [vmem:[%s1044_s4 + $0xa0] sm:$0xff] }
 0x4f9   :  { %vm278_vm13 = vcmp.eq.f32.partialorder %v268_v5, %v275_v11  ;;  %vm279_vm14 = vcmp.eq.f32.partialorder %v269_v6, %v275_v11  ;;  %v287_v13 = vshra.s32 %v285_v12, 16  ;;  %v286_v20 = vand.u32 65535, %v285_v12  ;;  %v403_v11 = vld [vmem:[%s1044_s4 + $0xa8] sm:$0xff] }
 0x4fa   :  { %v282_v14 = vsel %vm278_vm13, %v791_v51, 256  ;;  %v283_v15 = vsel %vm279_vm14, %v794_v52, 256  ;;  %v590_v12 = vpack.c.bf16 %v385_v48, %v384_v10 }
 0x4fb   :  { %vm300_vm15 = vcmp.lt.s32.totalorder %v282_v14, %v283_v15  ;;  %v289_v16 = vcvt.s32.f32 %v287_v13  ;;  %v288_v22 = vcvt.s32.f32 %v286_v20  ;;  %v592_v13 = vpack.c.bf16 %v403_v11, %v402_v49  ;;  %v388_v20 = vld [vmem:[%s1044_s4 + $0x30] sm:$0xff] }
 0x4fc   :  { %v301_v17 = vsel %vm300_vm15, %v282_v14, %v283_v15  ;;  %v386_v14 = vld [vmem:[%s1044_s4 + $0x20] sm:$0xff]  ;;  %v387_v15 = vld [vmem:[%s1044_s4 + $0x28] sm:$0xff] }
 0x4fd   :  { %290 = vmin.xlane.f32.xlu0 %v289_v16  ;;  %v303_v18 = vshra.s32 %v301_v17, 16  ;;  %v302_v23 = vand.u32 65535, %v301_v17  ;;  %v405_v17 = vld [vmem:[%s1044_s4 + $0xb8] sm:$0xff] }
 0x4ff   :  { %v305_v19 = vcvt.s32.f32 %v303_v18  ;;  %v304_v27 = vcvt.s32.f32 %v302_v23  ;;  %v594_v18 = vpack.c.bf16 %v387_v15, %v386_v14  ;;  %v407_v23 = vld [vmem:[%s1044_s4 + $0xc8] sm:$0xff] }
 0x501   :  { %306 = vmin.xlane.f32.xlu1 %v305_v19 }
 0x58a   :  { %v291_v21 = vpop.xlane.xlu0 %290 }
 0x58b   :  { %vm292_vm1 = vcmp.eq.f32.partialorder %v289_v16, %v291_v21  ;;  %v297_v29 = vcvt.f32.s32 %v291_v21  ;;  %v404_v16 = vld [vmem:[%s1044_s4 + $0xb0] sm:$0xff]  ;;  %v389_v21 = vld [vmem:[%s1044_s4 + $0x38] sm:$0xff] }
 0x58c   :  { %v293_v24 = vsel %vm292_vm1, %v288_v22, inf  ;;  %v406_v22 = vld [vmem:[%s1044_s4 + $0xc0] sm:$0xff] }
 0x58d   :  { %294 = vmin.xlane.f32.xlu0 %v293_v24  ;;  %v298_v31 = vshll.u32 %v297_v29, 16  ;;  %v598_v24 = vpack.c.bf16 %v389_v21, %v388_v20  ;;  %v408_v29 = vld [vmem:[%s1044_s4 + $0xd0] sm:$0xff] }
 0x58e   :  { %v307_v25 = vpop.xlane.xlu1 %306 }
 0x58f   :  { %vm308_vm2 = vcmp.eq.f32.partialorder %v305_v19, %v307_v25  ;;  %v313_v32 = vcvt.f32.s32 %v307_v25  ;;  %v596_v19 = vpack.c.bf16 %v405_v17, %v404_v16  ;;  %v600_v25 = vpack.c.bf16 %v407_v23, %v406_v22 }
 0x590   :  { %v309_v28 = vsel %vm308_vm2, %v304_v27, inf  ;;  %v390_v27 = vld [vmem:[%s1044_s4 + $0x40] sm:$0xff] }
 0x591   :  { %310 = vmin.xlane.f32.xlu1 %v309_v28  ;;  %v314_v36 = vshll.u32 %v313_v32, 16  ;;  %v391_v28 = vld [vmem:[%s1044_s4 + $0x48] sm:$0xff] }
 0x61a   :  { %v295_v30 = vpop.xlane.xlu0 %294 }
 0x61b   :  { %v296_v33 = vcvt.f32.s32 %v295_v30  ;;  %v409_v30 = vld [vmem:[%s1044_s4 + $0xd8] sm:$0xff] }
 0x61c   :  { %v604_v32 = vpack.c.bf16 %v409_v30, %v408_v29 }
 0x61d   :  { %v299_v34 = vadd.s32 %v298_v31, %v296_v33  ;;  %v602_v31 = vpack.c.bf16 %v391_v28, %v390_v27  ;;  %v392_v33 = vld [vmem:[%s1044_s4 + $0x50] sm:$0xff] }
 0x61e   :  { %v311_v35 = vpop.xlane.xlu1 %310 }
 0x61f   :  { %vm316_vm3 = vcmp.eq.s32.totalorder %v791_v51, %v299_v34  ;;  %vm317_vm4 = vcmp.eq.s32.totalorder %v794_v52, %v299_v34  ;;  %v312_v37 = vcvt.f32.s32 %v311_v35  ;;  %v393_v34 = vld [vmem:[%s1044_s4 + $0x58] sm:$0xff]  ;;  %v410_v35 = vld [vmem:[%s1044_s4 + $0xe0] sm:$0xff] }
 0x620   :  { %v857_v38 = vsel %vm316_vm3, -1.0, %v836_v63  ;;  %v859_v39 = vsel %vm317_vm4, -1.0, %v267_v0  ;;  %v861_v40 = vsel %vm317_vm4, %v267_v0, %v263_v1  ;;  %v864_v43 = vsel %vm316_vm3, %v836_v63, %v262_v2 }
 0x621   :  { %v315_v44 = vadd.s32 %v314_v36, %v312_v37  ;;  %v328_v45 = vmax.f32 %v857_v38, %v859_v39  ;;  %v411_v36 = vld [vmem:[%s1044_s4 + $0xe8] sm:$0xff]  ;;  %v606_v37 = vpack.c.bf16 %v393_v34, %v392_v33 }
 0x623   :  { %vm318_vm5 = vcmp.eq.s32.totalorder %v791_v51, %v315_v44  ;;  %vm319_vm6 = vcmp.eq.s32.totalorder %v794_v52, %v315_v44  ;;  %329 = vmax.xlane.f32.xlu0 %v328_v45  ;;  %v608_v44 = vpack.c.bf16 %v411_v36, %v410_v35 }
 0x624   :  { %v870_v46 = vsel %vm318_vm5, -1.0, %v268_v5  ;;  %v872_v47 = vsel %vm319_vm6, -1.0, %v269_v6  ;;  %v874_v50 = vsel %vm319_vm6, %v269_v6, %v265_v7  ;;  %v876_v53 = vsel %vm318_vm5, %v268_v5, %v264_v8  ;;  %v383_v5 = vld [vmem:[%s1044_s4 + $0x8] sm:$0xff]  ;;  %v400_v6 = vld [vmem:[%s1044_s4 + $0x90] sm:$0xff]  ;;  %v401_v7 = vld [vmem:[%s1044_s4 + $0x98] sm:$0xff] }
 0x625   :  { %v331_v54 = vmax.f32 %v870_v46, %v872_v47  ;;  %v586_v8 = vpack.c.bf16 %v383_v5, %v382_v41  ;;  %v588_v9 = vpack.c.bf16 %v401_v7, %v400_v6  ;;  %v614_v41 = vpack.c.bf16 %v397_v4, %v396_v3 }
 0x627   :  { %332 = vmax.xlane.f32.xlu1 %v331_v54  ;;  %587 = vmatpush3.bf16.msra.mxu1 %v586_v8 }
 0x628   :  { %589 = vmatprep.subr.bf16.mxu1 %v588_v9 }
 0x62b   :  { %591 = vmatpush3.bf16.msra.mxu1 %v590_v12 }
 0x62c   :  { %593 = vmatprep.subr.bf16.mxu1 %v592_v13 }
 0x62f   :  { %595 = vmatpush3.bf16.msra.mxu1 %v594_v18 }
 0x630   :  { %597 = vmatprep.subr.bf16.mxu1 %v596_v19 }
 0x633   :  { %599 = vmatpush3.bf16.msra.mxu1 %v598_v24 }
 0x634   :  { %601 = vmatprep.subr.bf16.mxu1 %v600_v25 }
 0x637   :  { %603 = vmatpush3.bf16.msra.mxu1 %v602_v31 }
 0x638   :  { %605 = vmatprep.subr.bf16.mxu1 %v604_v32 }
 0x63b   :  { %607 = vmatpush3.bf16.msra.mxu1 %v606_v37 }
 0x63c   :  { %609 = vmatprep.subr.bf16.mxu1 %v608_v44 }
 0x6b0   :  { %v330_v55 = vpop.xlane.xlu0 %329 }
 0x6b1   :  { %vm334_vm7 = vcmp.eq.f32.partialorder %v857_v38, %v330_v55  ;;  %vm335_vm8 = vcmp.eq.f32.partialorder %v859_v39, %v330_v55 }
 0x6b2   :  { %v338_v56 = vsel %vm334_vm7, %v791_v51, 256  ;;  %v339_v57 = vsel %vm335_vm8, %v794_v52, 256 }
 0x6b3   :  { %vm342_vm9 = vcmp.lt.s32.totalorder %v338_v56, %v339_v57 }
 0x6b4   :  { %v333_v58 = vpop.xlane.xlu1 %332  ;;  %v884_v59 = vsel %vm342_vm9, %v338_v56, %v339_v57 }
 0x6b5   :  { %vm336_vm10 = vcmp.eq.f32.partialorder %v870_v46, %v333_v58  ;;  %vm337_vm11 = vcmp.eq.f32.partialorder %v872_v47, %v333_v58  ;;  %v345_v60 = vshra.s32 %v884_v59, 16  ;;  %v344_v45 = vand.u32 65535, %v884_v59  ;;  %v395_v59 = vld [vmem:[%s1044_s4 + $0x68] sm:$0xff] }
 0x6b6   :  { %v340_v61 = vsel %vm336_vm10, %v791_v51, 256  ;;  %v341_v62 = vsel %vm337_vm11, %v794_v52, 256 }
 0x6b7   :  { %vm358_vm12 = vcmp.lt.s32.totalorder %v340_v61, %v341_v62  ;;  %v891_v63 = vcvt.s32.f32 %v345_v60  ;;  %v346_v55 = vcvt.s32.f32 %v344_v45 }
 0x6b8   :  { %v893_v0 = vsel %vm358_vm12, %v340_v61, %v341_v62  ;;  %v394_v62 = vld [vmem:[%s1044_s4 + $0x60] sm:$0xff] }
 0x6b9   :  { %348 = vmin.xlane.f32.xlu0 %v891_v63  ;;  %v361_v1 = vshra.s32 %v893_v0, 16  ;;  %v360_v56 = vand.u32 65535, %v893_v0  ;;  %v413_v0 = vld [vmem:[%s1044_s4 + $0xf8] sm:$0xff] }
 0x6bb   :  { %v897_v2 = vcvt.s32.f32 %v361_v1  ;;  %v362_v60 = vcvt.s32.f32 %v360_v56  ;;  %v610_v1 = vpack.c.bf16 %v395_v59, %v394_v62 }
 0x6bd   :  { %364 = vmin.xlane.f32.xlu1 %v897_v2  ;;  %611 = vmatpush3.bf16.msra.mxu1 %v610_v1 }
 0x746   :  { %v349_v54 = vpop.xlane.xlu0 %348 }
 0x747   :  { %vm350_vm13 = vcmp.eq.f32.partialorder %v891_v63, %v349_v54  ;;  %v412_v63 = vld [vmem:[%s1044_s4 + $0xf0] sm:$0xff]  ;;  %v355_v42 = vcvt.f32.s32 %v349_v54  ;;  %s672_s4 = smov [#allocation4]  }
 0x748   :  { %v351_v57 = vsel %vm350_vm13, %v346_v55, inf  ;;  %s512_s17 = sshll.u32 %s672_s4, 4  ;;  %s513_s17 = int_to_ptr.vmem [resolvable:$true] %s512_s17 }
 0x749   :  { %352 = vmin.xlane.f32.xlu0 %v351_v57  ;;  %v356_v6 = vshll.u32 %v355_v42, 16  ;;  %s623_s18 = scalar_lea.vmem %s513_s17, 512  ;;  %p628_p1 = scmp.lt.s32.totalorder %s513_s17, %s513_s17 }
 0x74a   :  { %v365_v58 = vpop.xlane.xlu1 %364  ;;  %p624_p0 = scmp.ne.s32.totalorder %s513_s17, %s623_s18  ;;  %p629_p2 = scmp.lt.s32.totalorder %s623_s18, %s623_s18 }
 0x74b   :  { %vm366_vm14 = vcmp.eq.f32.partialorder %v897_v2, %v365_v58  ;;  %v612_v2 = vpack.c.bf16 %v413_v0, %v412_v63  ;;  %v371_v7 = vcvt.f32.s32 %v365_v58 }
 0x74c   :  { %v367_v61 = vsel %vm366_vm14, %v362_v60, inf  ;;  %p630_p3 = por %p629_p2, %p628_p1 }
 0x74d   :  { %368 = vmin.xlane.f32.xlu1 %v367_v61  ;;  %613 = vmatprep.subr.bf16.mxu1 %v612_v2  ;;  %v372_v48 = vshll.u32 %v371_v7, 16 }
 0x74e   :  { %615 = vmatpush3.bf16.msra.mxu1 %v614_v41  ;;  %p631_p4 = pnand %p630_p3, %p624_p0 }
 0x7d6   :  { %v353_v5 = vpop.xlane.xlu0 %352 }
 0x7d7   :  { %v354_v8 = vcvt.f32.s32 %v353_v5 }
 0x7d9   :  { %v357_v9 = vadd.s32 %v356_v6, %v354_v8 }
 0x7da   :  { %v369_v10 = vpop.xlane.xlu1 %368 }
 0x7db   :  { %vm374_vm15 = vcmp.eq.s32.totalorder %v791_v51, %v357_v9  ;;  %v370_v49 = vcvt.f32.s32 %v369_v10  ;;  %vm375_vm1 = vcmp.eq.s32.totalorder %v794_v52, %v357_v9 }
 0x7dc   :  { %v379_v11 = vsel %vm375_vm1, %v859_v39, %v861_v40  ;;  %v378_v12 = vsel %vm374_vm15, %v857_v38, %v864_v43 }
 0x7dd   :  { %v373_v13 = vadd.s32 %v372_v48, %v370_v49  ;;  %478 = vmatprep.mubr.f32.mxu1 %v379_v11  ;;  %490 = vst [vmem:[#allocation4 + $0x8] sm:$0xff] %v379_v11  ;;  %489 = vst [vmem:[#allocation4] sm:$0xff] %v378_v12 }
 0x7de   :  { %479 = vmatmul.mubr.f32.vlgmr.msra.gmra.mrb[0].mxu1 %v378_v12 }
 0x7df   :  { %vm376_vm2 = vcmp.eq.s32.totalorder %v791_v51, %v373_v13  ;;  %vm377_vm3 = vcmp.eq.s32.totalorder %v794_v52, %v373_v13 }
 0x7e0   :  { %v381_v14 = vsel %vm377_vm3, %v872_v47, %v874_v50  ;;  %v380_v15 = vsel %vm376_vm2, %v870_v46, %v876_v53 }
 0x7e1   :  { %483 = vmatprep.mubr.f32.mxu1 %v381_v14  ;;  %492 = vst [vmem:[#allocation4 + $0x18] sm:$0xff] %v381_v14  ;;  %491 = vst [vmem:[#allocation4 + $0x10] sm:$0xff] %v380_v15 }
 0x7e2   :  { %484 = vmatmul.mubr.f32.gmra.mrb[2].mxu1 %v380_v15 }
 0x7e3   :  { %634 = shalt.err (!%p631_p4)
}
 0x7e4   :  { %s635_s21 = scalar_lea.hbm %s1046_s6, 512 }
 0x7e5   :  { %p636_p5 = scmp.ne.s32.totalorder %s1046_s6, %s635_s21  ;;  %p639_p6 = scmp.lt.u32.totalorder %s635_s21, %s1046_s6 }
 0x7e7   :  { %p641_p7 = pnand %p639_p6, %p636_p5 }
 0x7e9   :  { %644 = shalt.err (!%p641_p7)
}
 0x7ea   :  { %s673_s26 = smov 256   ;;  %s674_s27 = smov 16  }
 0x7eb   :  { %518 = dma.vmem_to_hbm [thread:$0]  %s513_s17, 512, %s1046_s6, [#allocation5], %s673_s26, %s673_s26, %s674_s27  }
 0x7ec   :  { %s675_s30 = smov [#allocation2]  }
 0x7ed   :  { %s500_s7 = sshll.u32 %s675_s30, 4  ;;  %s501_s7 = int_to_ptr.vmem [resolvable:$true] %s500_s7 }
 0x7ee   :  { %s645_s8 = scalar_lea.vmem %s501_s7, 256  ;;  %p650_p9 = scmp.lt.s32.totalorder %s501_s7, %s501_s7 }
 0x7ef   :  { %p646_p8 = scmp.ne.s32.totalorder %s501_s7, %s645_s8  ;;  %p651_p10 = scmp.lt.s32.totalorder %s645_s8, %s645_s8 }
 0x7f1   :  { %p652_p11 = por %p651_p10, %p650_p9 }
 0x7f3   :  { %p653_p12 = pnand %p652_p11, %p646_p8 }
 0x8b1   :  { %v562_v51 = vpop.f32.mrb[0].mxu1 }
 0x8b2   :  { %v563_v52 = vpop.f32.mrb[1].mxu1 }
 0x8b3   :  { %v564_v38 = vadd.f32 %v563_v52, %v562_v51 }
 0x8b5   :  { %v481_v39 = vadd.f32 %v564_v38, %v767_v26  ;;  %v565_v40 = vpop.f32.mrb[2].mxu1 }
 0x8b6   :  { %v566_v43 = vpop.f32.mrb[3].mxu1 }
 0x8b7   :  { %493 = vst.msk [vmem:[#allocation2] sm:$0xff] %vm63_vm0, %v481_v39  ;;  %v567_v46 = vadd.f32 %v566_v43, %v565_v40 }
 0x8b9   :  { %v486_v47 = vadd.f32 %v567_v46, %v767_v26 }
 0x8bb   :  { %494 = vst.msk [vmem:[#allocation2 + $0x8] sm:$0xff] %vm63_vm0, %v486_v47 }
 0x8bc   :  { %656 = shalt.err (!%p653_p12)
}
 0x8bd   :  { %s657_s10 = scalar_lea.hbm %s1045_s5, 256 }
 0x8be   :  { %p658_p13 = scmp.ne.s32.totalorder %s1045_s5, %s657_s10  ;;  %p661_p0 = scmp.lt.u32.totalorder %s657_s10, %s1045_s5 }
 0x8c0   :  { %p663_p1 = pnand %p661_p0, %p658_p13 }
 0x8c2   :  { %666 = shalt.err (!%p663_p1)
}
 0x8c3   :  { %s676_s11 = smov 128   ;;  %s677_s12 = smov 8  }
 0x8c4   :  { %506 = dma.vmem_to_hbm [thread:$0]  %s501_s7, 256, %s1045_s5, [#allocation3], %s676_s11, %s676_s11, %s677_s12  }
 0x8c5   :  { %667 = dma.done.wait [#allocation3], 256  }
 0x8c6   :  { %668 = vsyncadd [#allocation3], 4294967040 }
 0x8c7   :  { %669 = dma.done.wait [#allocation5], 512  }
 0x8c8   :  { %670 = vsyncadd [#allocation5], 4294966784 }
 0x8c9   :  { %525 = vsyncpa [#allocation3], 1 }
 0x8ca   :  { %526 = vsyncpa [#allocation5], 1 }

</bundles_post_ra>
